<compile_context>
chip_gen: v5e
topology: v5e:2x2
jax: 0.10.0
libtpu: 0.0.40
codegen_flags: <defaults>
</compile_context>

<pallas_src>
import jax
import jax.numpy as jnp
from jax import lax
from jax.experimental import pallas as pl
from jax.experimental.pallas import tpu as pltpu

HIDDEN = 5
INPUT = 3
LAYERS = 2

LANES = 128     # lane-padded feature width
B_PAD = 8       # sublane-padded batch
X_BWD = 8       # lane offset where the time-reversed input copy lives (input layout only)


def _fused_birnn_kernel(x_ref, w0_ref, whh0_ref, b0_ref, h00_ref,
                        w1a_ref, w1b_ref, whh1_ref, b1_ref, h01_ref,
                        out_ref, hT0_ref, hT1_ref,
                        proj0_scr, proj1_scr, h_scr):
    """Whole bidirectional 2-layer RNN in one kernel.

    Hidden-lane layout: forward state in lanes [0:HIDDEN], backward state in
    lanes [HIDDEN:2*HIDDEN].  Row-block s of the flat (T*B_PAD, 128) buffers
    corresponds to recurrence step s (fwd time s, bwd time T-1-s).
    """
    TB = x_ref.shape[0]
    T = TB // B_PAD

    lane = lax.broadcasted_iota(jnp.int32, (B_PAD, LANES), 1)
    fwd_lanes = lane < HIDDEN          # lanes holding forward-direction values

    # -------- layer 0: hoisted, already step-mixed input projection (1 MXU pass)
    proj0_scr[...] = jnp.dot(x_ref[...], w0_ref[...],
                             preferred_element_type=jnp.float32) + b0_ref[...]
    # -------- layer 1: projection accumulator seeded with the layer-1 bias
    proj1_scr[...] = jnp.broadcast_to(b1_ref[...], proj1_scr.shape)

    # -------- layer 0: packed bidirectional recurrence, layer-1 proj interleaved
    h_scr[...] = h00_ref[...]
    for s in range(T):                 # static unroll (T tiny & static)
        lo = s * B_PAD                 # fwd time index  s
        hi = (T - 1 - s) * B_PAD       # bwd time index  T-1-s
        h_new = jnp.tanh(proj0_scr[pl.ds(lo, B_PAD), :]
                         + jnp.dot(h_scr[...], whh0_ref[...],
                                   preferred_element_type=jnp.float32))
        h_scr[...] = h_new
        # Layer-1 input projection hidden under the tanh dependency chain.
        # (w1a/w1b zero out the stale half of h_new's lanes -- see prepare_params.)
        proj1_scr[pl.ds(lo, B_PAD), :] = (
            proj1_scr[pl.ds(lo, B_PAD), :]
            + jnp.dot(h_new, w1a_ref[...], preferred_element_type=jnp.float32))
        proj1_scr[pl.ds(hi, B_PAD), :] = (
            proj1_scr[pl.ds(hi, B_PAD), :]
            + jnp.dot(h_new, w1b_ref[...], preferred_element_type=jnp.float32))
    hT0_ref[...] = h_scr[...]

    # -------- layer 1: packed bidirectional recurrence, packed output writeback
    h_scr[...] = h01_ref[...]
    for s in range(T):
        lo = s * B_PAD
        hi = (T - 1 - s) * B_PAD
        h_new = jnp.tanh(proj1_scr[pl.ds(lo, B_PAD), :]
                         + jnp.dot(h_scr[...], whh1_ref[...],
                                   preferred_element_type=jnp.float32))
        h_scr[...] = h_new
        # fwd lanes of h_new are the output at time s, bwd lanes at time T-1-s;
        # read-modify-write keeps the other direction's already-written lanes.
        out_ref[pl.ds(lo, B_PAD), :] = jnp.where(
            fwd_lanes, h_new, out_ref[pl.ds(lo, B_PAD), :])
        out_ref[pl.ds(hi, B_PAD), :] = jnp.where(
            fwd_lanes, out_ref[pl.ds(hi, B_PAD), :], h_new)
    hT1_ref[...] = h_scr[...]


def prepare_params(params):
    """One-time padding/packing of the PyTorch-style parameters."""
    H = HIDDEN

    def zmat():
        return jnp.zeros((LANES, LANES), jnp.float32)

    (w0f_ih, w0f_hh, b0f_ih, b0f_hh) = params[(0, 0)]
    (w0b_ih, w0b_hh, b0b_ih, b0b_hh) = params[(0, 1)]
    (w1f_ih, w1f_hh, b1f_ih, b1f_hh) = params[(1, 0)]
    (w1b_ih, w1b_hh, b1b_ih, b1b_hh) = params[(1, 1)]

    # ---- layer 0 -----------------------------------------------------------
    # input-lane layout : x[s] in lanes [0:3], x[T-1-s] in lanes [X_BWD:X_BWD+3]
    # hidden-lane layout: fwd in lanes [0:5], bwd in lanes [5:10]
    w0 = (zmat()
          .at[:INPUT, :H].set(w0f_ih.T)
          .at[X_BWD:X_BWD + INPUT, H:2 * H].set(w0b_ih.T))
    whh0 = (zmat()
            .at[:H, :H].set(w0f_hh.T)
            .at[H:2 * H, H:2 * H].set(w0b_hh.T))
    b0 = (jnp.zeros((1, LANES), jnp.float32)
          .at[0, :H].set(b0f_ih + b0f_hh)
          .at[0, H:2 * H].set(b0b_ih + b0b_hh))

    # ---- layer 1 -----------------------------------------------------------
    # Packed layer-0 state at step s = [fwd0(s) | bwd0(T-1-s)].  The layer-1
    # projection buffer is kept in recurrence-step order, so contributions split:
    #   w1a ("same row")   : fwd0(s)      -> fwd proj(s)     cols [0:5]
    #                        bwd0(T-1-s)  -> bwd proj(T-1-s) cols [5:10]
    #   w1b ("mirror row") : fwd0(s)      -> bwd proj(s)     cols [5:10]
    #                        bwd0(T-1-s)  -> fwd proj(T-1-s) cols [0:5]
    # SAFETY: all other rows of w1a/w1b stay zero so the stale half of the
    # packed state (and padded lanes) can never leak into layer 1.
    w1a = (zmat()
           .at[:H, :H].set(w1f_ih.T[:H])
           .at[H:2 * H, H:2 * H].set(w1b_ih.T[H:]))
    w1b = (zmat()
           .at[:H, H:2 * H].set(w1b_ih.T[:H])
           .at[H:2 * H, :H].set(w1f_ih.T[H:]))
    whh1 = (zmat()
            .at[:H, :H].set(w1f_hh.T)
            .at[H:2 * H, H:2 * H].set(w1b_hh.T))
    b1 = (jnp.zeros((1, LANES), jnp.float32)
          .at[0, :H].set(b1f_ih + b1f_hh)
          .at[0, H:2 * H].set(b1b_ih + b1b_hh))

    return dict(w0=w0, whh0=whh0, b0=b0, w1a=w1a, w1b=w1b, whh1=whh1, b1=b1)


def net_rnn_forward(x, h0, packed):
    """Matches nn.RNN(3, 5, 2, bidirectional=True)(x, h0)."""
    H = HIDDEN
    T, B, feat = x.shape
    # Pack x and its time-reverse into one buffer so the layer-0 projection
    # comes out already mixed per recurrence step.
    x_pack = (jnp.zeros((T, B_PAD, LANES), jnp.float32)
              .at[:, :B, :feat].set(x)
              .at[:, :B, X_BWD:X_BWD + feat].set(x[::-1]))
    x_flat = x_pack.reshape(T * B_PAD, LANES)
    h00 = (jnp.zeros((B_PAD, LANES), jnp.float32)
           .at[:B, :H].set(h0[0])
           .at[:B, H:2 * H].set(h0[1]))
    h01 = (jnp.zeros((B_PAD, LANES), jnp.float32)
           .at[:B, :H].set(h0[2])
           .at[:B, H:2 * H].set(h0[3]))

    out, hT0, hT1 = pl.pallas_call(
        _fused_birnn_kernel,
        out_shape=(jax.ShapeDtypeStruct((T * B_PAD, LANES), jnp.float32),
                   jax.ShapeDtypeStruct((B_PAD, LANES), jnp.float32),
                   jax.ShapeDtypeStruct((B_PAD, LANES), jnp.float32)),
        scratch_shapes=[
            pltpu.VMEM((T * B_PAD, LANES), jnp.float32),   # proj0 (layer-0 pre-act)
            pltpu.VMEM((T * B_PAD, LANES), jnp.float32),   # proj1 (layer-1 pre-act acc)
            pltpu.VMEM((B_PAD, LANES), jnp.float32),       # h carry
        ],
    )(x_flat, packed["w0"], packed["whh0"], packed["b0"], h00,
      packed["w1a"], packed["w1b"], packed["whh1"], packed["b1"], h01)

    # Single contiguous slice (fwd|bwd already packed in lanes [0:2H]).
    output = out.reshape(T, B_PAD, LANES)[:, :B, :2 * H]
    h_n = jnp.stack([hT0[:B, :H], hT0[:B, H:2 * H],
                     hT1[:B, :H], hT1[:B, H:2 * H]], axis=0)
    return output, h_n


def _rnn_ref(x, h0, params):
    """Pure-JAX reference (PyTorch nn.RNN semantics) for correctness check."""
    T, B, _ = x.shape
    layer_in = x
    h_n = []
    for layer in range(LAYERS):
        dir_outs = []
        for d in range(2):
            wih, whh, bih, bhh = params[(layer, d)]
            xs = layer_in if d == 0 else layer_in[::-1]
            h = h0[layer * 2 + d]
            hs = []
            for t in range(T):
                h = jnp.tanh(xs[t] @ wih.T + bih + h @ whh.T + bhh)
                hs.append(h)
            hs = jnp.stack(hs)
            if d == 1:
                hs = hs[::-1]
            dir_outs.append(hs)
            h_n.append(h)
        layer_in = jnp.concatenate(dir_outs, axis=-1)
    return layer_in, jnp.stack(h_n)


def _init_params(key):
    """Deterministic init, same shapes / U(-1/sqrt(H), 1/sqrt(H)) scheme as nn.RNN."""
    k = 1.0 / jnp.sqrt(jnp.float32(HIDDEN))
    params = {}
    for layer in range(LAYERS):
        in_feat = INPUT if layer == 0 else 2 * HIDDEN
        for d in range(2):
            key, k1, k2, k3, k4 = jax.random.split(key, 5)
            wih = jax.random.uniform(k1, (HIDDEN, in_feat), jnp.float32, -k, k)
            whh = jax.random.uniform(k2, (HIDDEN, HIDDEN), jnp.float32, -k, k)
            bih = jax.random.uniform(k3, (HIDDEN,), jnp.float32, -k, k)
            bhh = jax.random.uniform(k4, (HIDDEN,), jnp.float32, -k, k)
            params[(layer, d)] = (wih, whh, bih, bhh)
    return params


if __name__ == "__main__":
    key = jax.random.PRNGKey(0)
    kx, kh, kp = jax.random.split(key, 3)

    T, B = 8, 2
    x = jax.random.normal(kx, (T, B, INPUT), jnp.float32)
    h0 = jax.random.normal(kh, (LAYERS * 2, B, HIDDEN), jnp.float32)
    params = _init_params(kp)

    packed = prepare_params(params)          # one-time weight padding/packing
    fwd = jax.jit(net_rnn_forward)

    output, h_n = fwd(x, h0, packed)
    output = jax.block_until_ready(output)
    h_n = jax.block_until_ready(h_n)

    out_ref, h_ref = _rnn_ref(x, h0, params)
    assert output.shape == (T, B, 2 * HIDDEN)
    assert h_n.shape == (LAYERS * 2, B, HIDDEN)
    # Tolerance relies on full-f32 MXU precision; do NOT cast inputs to bf16.
    assert jnp.max(jnp.abs(output - out_ref)) < 1e-5
    assert jnp.max(jnp.abs(h_n - h_ref)) < 1e-5

    print("KERNEL_OK")
</pallas_src>

<mosaic_0001>
module attributes {stable_mosaic.version = 11 : i64} {
  func.func @_fused_birnn_kernel(%arg0: memref<64x128xf32, #tpu.memory_space<vmem>>, %arg1: memref<128x128xf32, #tpu.memory_space<vmem>>, %arg2: memref<128x128xf32, #tpu.memory_space<vmem>>, %arg3: memref<1x128xf32, #tpu.memory_space<vmem>>, %arg4: memref<8x128xf32, #tpu.memory_space<vmem>>, %arg5: memref<128x128xf32, #tpu.memory_space<vmem>>, %arg6: memref<128x128xf32, #tpu.memory_space<vmem>>, %arg7: memref<128x128xf32, #tpu.memory_space<vmem>>, %arg8: memref<1x128xf32, #tpu.memory_space<vmem>>, %arg9: memref<8x128xf32, #tpu.memory_space<vmem>>, %arg10: memref<64x128xf32, #tpu.memory_space<vmem>>, %arg11: memref<8x128xf32, #tpu.memory_space<vmem>>, %arg12: memref<8x128xf32, #tpu.memory_space<vmem>>, %arg13: memref<64x128xf32, #tpu.memory_space<vmem>>, %arg14: memref<64x128xf32, #tpu.memory_space<vmem>>, %arg15: memref<8x128xf32, #tpu.memory_space<vmem>>) attributes {dimension_semantics = [], scalar_prefetch = 0 : i64, scratch_operands = 3 : i64, tpu.core_type = #tpu.core_type<tc>} {
    %0 = tpu.iota {dimensions = array<i32: 1>} : vector<8x128xi32>
    %c5_i32 = arith.constant 5 : i32
    %1 = vector.broadcast %c5_i32 : i32 to vector<8x128xi32>
    %2 = arith.cmpi slt, %0, %1 : vector<8x128xi32>
    %c0 = arith.constant 0 : index
    %c0_0 = arith.constant 0 : index
    %3 = vector.load %arg0[%c0, %c0_0] : memref<64x128xf32, #tpu.memory_space<vmem>>, vector<64x128xf32>
    %c0_1 = arith.constant 0 : index
    %c0_2 = arith.constant 0 : index
    %4 = vector.load %arg1[%c0_1, %c0_2] : memref<128x128xf32, #tpu.memory_space<vmem>>, vector<128x128xf32>
    %cst = arith.constant dense<0.000000e+00> : vector<64x128xf32>
    %5 = tpu.matmul %3, %4, %cst {dimension_numbers = #tpu.dot_dimension_numbers<[1], [0], [0], [1], [0, 0, 1, 1], [], []>} : vector<64x128xf32>, vector<128x128xf32>, vector<64x128xf32> -> vector<64x128xf32>
    %c0_3 = arith.constant 0 : index
    %c0_4 = arith.constant 0 : index
    %6 = vector.load %arg3[%c0_3, %c0_4] : memref<1x128xf32, #tpu.memory_space<vmem>>, vector<1x128xf32>
    %7 = vector.broadcast %6 : vector<1x128xf32> to vector<64x128xf32>
    %8 = arith.addf %5, %7 : vector<64x128xf32>
    %c0_5 = arith.constant 0 : index
    %c0_6 = arith.constant 0 : index
    %9 = vector.load %arg13[%c0_5, %c0_6] : memref<64x128xf32, #tpu.memory_space<vmem>>, vector<64x128xf32>
    tpu.vector_store %arg13[%c0_5, %c0_6], %8 {strides = array<i32>} : memref<64x128xf32, #tpu.memory_space<vmem>>, vector<64x128xf32>,
    %c0_7 = arith.constant 0 : index
    %c0_8 = arith.constant 0 : index
    %10 = vector.load %arg8[%c0_7, %c0_8] : memref<1x128xf32, #tpu.memory_space<vmem>>, vector<1x128xf32>
    %11 = vector.shape_cast %10 : vector<1x128xf32> to vector<1x128xf32>
    %12 = vector.broadcast %11 : vector<1x128xf32> to vector<64x128xf32>
    %c0_9 = arith.constant 0 : index
    %c0_10 = arith.constant 0 : index
    %13 = vector.load %arg14[%c0_9, %c0_10] : memref<64x128xf32, #tpu.memory_space<vmem>>, vector<64x128xf32>
    tpu.vector_store %arg14[%c0_9, %c0_10], %12 {strides = array<i32>} : memref<64x128xf32, #tpu.memory_space<vmem>>, vector<64x128xf32>,
    %c0_11 = arith.constant 0 : index
    %c0_12 = arith.constant 0 : index
    %14 = vector.load %arg4[%c0_11, %c0_12] : memref<8x128xf32, #tpu.memory_space<vmem>>, vector<8x128xf32>
    %c0_13 = arith.constant 0 : index
    %c0_14 = arith.constant 0 : index
    %15 = vector.load %arg15[%c0_13, %c0_14] : memref<8x128xf32, #tpu.memory_space<vmem>>, vector<8x128xf32>
    tpu.vector_store %arg15[%c0_13, %c0_14], %14 {strides = array<i32>} : memref<8x128xf32, #tpu.memory_space<vmem>>, vector<8x128xf32>,
    %c0_15 = arith.constant 0 : index
    %c0_16 = arith.constant 0 : index
    %16 = vector.load %arg13[%c0_15, %c0_16] : memref<64x128xf32, #tpu.memory_space<vmem>>, vector<8x128xf32>
    %c0_17 = arith.constant 0 : index
    %c0_18 = arith.constant 0 : index
    %17 = vector.load %arg15[%c0_17, %c0_18] : memref<8x128xf32, #tpu.memory_space<vmem>>, vector<8x128xf32>
    %c0_19 = arith.constant 0 : index
    %c0_20 = arith.constant 0 : index
    %18 = vector.load %arg2[%c0_19, %c0_20] : memref<128x128xf32, #tpu.memory_space<vmem>>, vector<128x128xf32>
    %cst_21 = arith.constant dense<0.000000e+00> : vector<8x128xf32>
    %19 = tpu.matmul %17, %18, %cst_21 {dimension_numbers = #tpu.dot_dimension_numbers<[1], [0], [0], [1], [0, 0, 1, 1], [], []>} : vector<8x128xf32>, vector<128x128xf32>, vector<8x128xf32> -> vector<8x128xf32>
    %20 = arith.addf %16, %19 : vector<8x128xf32>
    %21 = math.tanh %20 : vector<8x128xf32>
    %c0_22 = arith.constant 0 : index
    %c0_23 = arith.constant 0 : index
    %22 = vector.load %arg15[%c0_22, %c0_23] : memref<8x128xf32, #tpu.memory_space<vmem>>, vector<8x128xf32>
    tpu.vector_store %arg15[%c0_22, %c0_23], %21 {strides = array<i32>} : memref<8x128xf32, #tpu.memory_space<vmem>>, vector<8x128xf32>,
    %c0_24 = arith.constant 0 : index
    %c0_25 = arith.constant 0 : index
    %23 = vector.load %arg14[%c0_24, %c0_25] : memref<64x128xf32, #tpu.memory_space<vmem>>, vector<8x128xf32>
    %c0_26 = arith.constant 0 : index
    %c0_27 = arith.constant 0 : index
    %24 = vector.load %arg5[%c0_26, %c0_27] : memref<128x128xf32, #tpu.memory_space<vmem>>, vector<128x128xf32>
    %cst_28 = arith.constant dense<0.000000e+00> : vector<8x128xf32>
    %25 = tpu.matmul %21, %24, %cst_28 {dimension_numbers = #tpu.dot_dimension_numbers<[1], [0], [0], [1], [0, 0, 1, 1], [], []>} : vector<8x128xf32>, vector<128x128xf32>, vector<8x128xf32> -> vector<8x128xf32>
    %26 = arith.addf %23, %25 : vector<8x128xf32>
    %c0_29 = arith.constant 0 : index
    %c0_30 = arith.constant 0 : index
    %27 = vector.load %arg14[%c0_29, %c0_30] : memref<64x128xf32, #tpu.memory_space<vmem>>, vector<8x128xf32>
    tpu.vector_store %arg14[%c0_29, %c0_30], %26 {strides = array<i32>} : memref<64x128xf32, #tpu.memory_space<vmem>>, vector<8x128xf32>,
    %c56 = arith.constant 56 : index
    %c0_31 = arith.constant 0 : index
    %28 = vector.load %arg14[%c56, %c0_31] : memref<64x128xf32, #tpu.memory_space<vmem>>, vector<8x128xf32>
    %c0_32 = arith.constant 0 : index
    %c0_33 = arith.constant 0 : index
    %29 = vector.load %arg6[%c0_32, %c0_33] : memref<128x128xf32, #tpu.memory_space<vmem>>, vector<128x128xf32>
    %cst_34 = arith.constant dense<0.000000e+00> : vector<8x128xf32>
    %30 = tpu.matmul %21, %29, %cst_34 {dimension_numbers = #tpu.dot_dimension_numbers<[1], [0], [0], [1], [0, 0, 1, 1], [], []>} : vector<8x128xf32>, vector<128x128xf32>, vector<8x128xf32> -> vector<8x128xf32>
    %31 = arith.addf %28, %30 : vector<8x128xf32>
    %c56_35 = arith.constant 56 : index
    %c0_36 = arith.constant 0 : index
    %32 = vector.load %arg14[%c56_35, %c0_36] : memref<64x128xf32, #tpu.memory_space<vmem>>, vector<8x128xf32>
    tpu.vector_store %arg14[%c56_35, %c0_36], %31 {strides = array<i32>} : memref<64x128xf32, #tpu.memory_space<vmem>>, vector<8x128xf32>,
    %c8 = arith.constant 8 : index
    %c0_37 = arith.constant 0 : index
    %33 = vector.load %arg13[%c8, %c0_37] : memref<64x128xf32, #tpu.memory_space<vmem>>, vector<8x128xf32>
    %c0_38 = arith.constant 0 : index
    %c0_39 = arith.constant 0 : index
    %34 = vector.load %arg15[%c0_38, %c0_39] : memref<8x128xf32, #tpu.memory_space<vmem>>, vector<8x128xf32>
    %c0_40 = arith.constant 0 : index
    %c0_41 = arith.constant 0 : index
    %35 = vector.load %arg2[%c0_40, %c0_41] : memref<128x128xf32, #tpu.memory_space<vmem>>, vector<128x128xf32>
    %cst_42 = arith.constant dense<0.000000e+00> : vector<8x128xf32>
    %36 = tpu.matmul %34, %35, %cst_42 {dimension_numbers = #tpu.dot_dimension_numbers<[1], [0], [0], [1], [0, 0, 1, 1], [], []>} : vector<8x128xf32>, vector<128x128xf32>, vector<8x128xf32> -> vector<8x128xf32>
    %37 = arith.addf %33, %36 : vector<8x128xf32>
    %38 = math.tanh %37 : vector<8x128xf32>
    %c0_43 = arith.constant 0 : index
    %c0_44 = arith.constant 0 : index
    %39 = vector.load %arg15[%c0_43, %c0_44] : memref<8x128xf32, #tpu.memory_space<vmem>>, vector<8x128xf32>
    tpu.vector_store %arg15[%c0_43, %c0_44], %38 {strides = array<i32>} : memref<8x128xf32, #tpu.memory_space<vmem>>, vector<8x128xf32>,
    %c8_45 = arith.constant 8 : index
    %c0_46 = arith.constant 0 : index
    %40 = vector.load %arg14[%c8_45, %c0_46] : memref<64x128xf32, #tpu.memory_space<vmem>>, vector<8x128xf32>
    %c0_47 = arith.constant 0 : index
    %c0_48 = arith.constant 0 : index
    %41 = vector.load %arg5[%c0_47, %c0_48] : memref<128x128xf32, #tpu.memory_space<vmem>>, vector<128x128xf32>
    %cst_49 = arith.constant dense<0.000000e+00> : vector<8x128xf32>
    %42 = tpu.matmul %38, %41, %cst_49 {dimension_numbers = #tpu.dot_dimension_numbers<[1], [0], [0], [1], [0, 0, 1, 1], [], []>} : vector<8x128xf32>, vector<128x128xf32>, vector<8x128xf32> -> vector<8x128xf32>
    %43 = arith.addf %40, %42 : vector<8x128xf32>
    %c8_50 = arith.constant 8 : index
    %c0_51 = arith.constant 0 : index
    %44 = vector.load %arg14[%c8_50, %c0_51] : memref<64x128xf32, #tpu.memory_space<vmem>>, vector<8x128xf32>
    tpu.vector_store %arg14[%c8_50, %c0_51], %43 {strides = array<i32>} : memref<64x128xf32, #tpu.memory_space<vmem>>, vector<8x128xf32>,
    %c48 = arith.constant 48 : index
    %c0_52 = arith.constant 0 : index
    %45 = vector.load %arg14[%c48, %c0_52] : memref<64x128xf32, #tpu.memory_space<vmem>>, vector<8x128xf32>
    %c0_53 = arith.constant 0 : index
    %c0_54 = arith.constant 0 : index
    %46 = vector.load %arg6[%c0_53, %c0_54] : memref<128x128xf32, #tpu.memory_space<vmem>>, vector<128x128xf32>
    %cst_55 = arith.constant dense<0.000000e+00> : vector<8x128xf32>
    %47 = tpu.matmul %38, %46, %cst_55 {dimension_numbers = #tpu.dot_dimension_numbers<[1], [0], [0], [1], [0, 0, 1, 1], [], []>} : vector<8x128xf32>, vector<128x128xf32>, vector<8x128xf32> -> vector<8x128xf32>
    %48 = arith.addf %45, %47 : vector<8x128xf32>
    %c48_56 = arith.constant 48 : index
    %c0_57 = arith.constant 0 : index
    %49 = vector.load %arg14[%c48_56, %c0_57] : memref<64x128xf32, #tpu.memory_space<vmem>>, vector<8x128xf32>
    tpu.vector_store %arg14[%c48_56, %c0_57], %48 {strides = array<i32>} : memref<64x128xf32, #tpu.memory_space<vmem>>, vector<8x128xf32>,
    %c16 = arith.constant 16 : index
    %c0_58 = arith.constant 0 : index
    %50 = vector.load %arg13[%c16, %c0_58] : memref<64x128xf32, #tpu.memory_space<vmem>>, vector<8x128xf32>
    %c0_59 = arith.constant 0 : index
    %c0_60 = arith.constant 0 : index
    %51 = vector.load %arg15[%c0_59, %c0_60] : memref<8x128xf32, #tpu.memory_space<vmem>>, vector<8x128xf32>
    %c0_61 = arith.constant 0 : index
    %c0_62 = arith.constant 0 : index
    %52 = vector.load %arg2[%c0_61, %c0_62] : memref<128x128xf32, #tpu.memory_space<vmem>>, vector<128x128xf32>
    %cst_63 = arith.constant dense<0.000000e+00> : vector<8x128xf32>
    %53 = tpu.matmul %51, %52, %cst_63 {dimension_numbers = #tpu.dot_dimension_numbers<[1], [0], [0], [1], [0, 0, 1, 1], [], []>} : vector<8x128xf32>, vector<128x128xf32>, vector<8x128xf32> -> vector<8x128xf32>
    %54 = arith.addf %50, %53 : vector<8x128xf32>
    %55 = math.tanh %54 : vector<8x128xf32>
    %c0_64 = arith.constant 0 : index
    %c0_65 = arith.constant 0 : index
    %56 = vector.load %arg15[%c0_64, %c0_65] : memref<8x128xf32, #tpu.memory_space<vmem>>, vector<8x128xf32>
    tpu.vector_store %arg15[%c0_64, %c0_65], %55 {strides = array<i32>} : memref<8x128xf32, #tpu.memory_space<vmem>>, vector<8x128xf32>,
    %c16_66 = arith.constant 16 : index
    %c0_67 = arith.constant 0 : index
    %57 = vector.load %arg14[%c16_66, %c0_67] : memref<64x128xf32, #tpu.memory_space<vmem>>, vector<8x128xf32>
    %c0_68 = arith.constant 0 : index
    %c0_69 = arith.constant 0 : index
    %58 = vector.load %arg5[%c0_68, %c0_69] : memref<128x128xf32, #tpu.memory_space<vmem>>, vector<128x128xf32>
    %cst_70 = arith.constant dense<0.000000e+00> : vector<8x128xf32>
    %59 = tpu.matmul %55, %58, %cst_70 {dimension_numbers = #tpu.dot_dimension_numbers<[1], [0], [0], [1], [0, 0, 1, 1], [], []>} : vector<8x128xf32>, vector<128x128xf32>, vector<8x128xf32> -> vector<8x128xf32>
    %60 = arith.addf %57, %59 : vector<8x128xf32>
    %c16_71 = arith.constant 16 : index
    %c0_72 = arith.constant 0 : index
    %61 = vector.load %arg14[%c16_71, %c0_72] : memref<64x128xf32, #tpu.memory_space<vmem>>, vector<8x128xf32>
    tpu.vector_store %arg14[%c16_71, %c0_72], %60 {strides = array<i32>} : memref<64x128xf32, #tpu.memory_space<vmem>>, vector<8x128xf32>,
    %c40 = arith.constant 40 : index
    %c0_73 = arith.constant 0 : index
    %62 = vector.load %arg14[%c40, %c0_73] : memref<64x128xf32, #tpu.memory_space<vmem>>, vector<8x128xf32>
    %c0_74 = arith.constant 0 : index
    %c0_75 = arith.constant 0 : index
    %63 = vector.load %arg6[%c0_74, %c0_75] : memref<128x128xf32, #tpu.memory_space<vmem>>, vector<128x128xf32>
    %cst_76 = arith.constant dense<0.000000e+00> : vector<8x128xf32>
    %64 = tpu.matmul %55, %63, %cst_76 {dimension_numbers = #tpu.dot_dimension_numbers<[1], [0], [0], [1], [0, 0, 1, 1], [], []>} : vector<8x128xf32>, vector<128x128xf32>, vector<8x128xf32> -> vector<8x128xf32>
    %65 = arith.addf %62, %64 : vector<8x128xf32>
    %c40_77 = arith.constant 40 : index
    %c0_78 = arith.constant 0 : index
    %66 = vector.load %arg14[%c40_77, %c0_78] : memref<64x128xf32, #tpu.memory_space<vmem>>, vector<8x128xf32>
    tpu.vector_store %arg14[%c40_77, %c0_78], %65 {strides = array<i32>} : memref<64x128xf32, #tpu.memory_space<vmem>>, vector<8x128xf32>,
    %c24 = arith.constant 24 : index
    %c0_79 = arith.constant 0 : index
    %67 = vector.load %arg13[%c24, %c0_79] : memref<64x128xf32, #tpu.memory_space<vmem>>, vector<8x128xf32>
    %c0_80 = arith.constant 0 : index
    %c0_81 = arith.constant 0 : index
    %68 = vector.load %arg15[%c0_80, %c0_81] : memref<8x128xf32, #tpu.memory_space<vmem>>, vector<8x128xf32>
    %c0_82 = arith.constant 0 : index
    %c0_83 = arith.constant 0 : index
    %69 = vector.load %arg2[%c0_82, %c0_83] : memref<128x128xf32, #tpu.memory_space<vmem>>, vector<128x128xf32>
    %cst_84 = arith.constant dense<0.000000e+00> : vector<8x128xf32>
    %70 = tpu.matmul %68, %69, %cst_84 {dimension_numbers = #tpu.dot_dimension_numbers<[1], [0], [0], [1], [0, 0, 1, 1], [], []>} : vector<8x128xf32>, vector<128x128xf32>, vector<8x128xf32> -> vector<8x128xf32>
    %71 = arith.addf %67, %70 : vector<8x128xf32>
    %72 = math.tanh %71 : vector<8x128xf32>
    %c0_85 = arith.constant 0 : index
    %c0_86 = arith.constant 0 : index
    %73 = vector.load %arg15[%c0_85, %c0_86] : memref<8x128xf32, #tpu.memory_space<vmem>>, vector<8x128xf32>
    tpu.vector_store %arg15[%c0_85, %c0_86], %72 {strides = array<i32>} : memref<8x128xf32, #tpu.memory_space<vmem>>, vector<8x128xf32>,
    %c24_87 = arith.constant 24 : index
    %c0_88 = arith.constant 0 : index
    %74 = vector.load %arg14[%c24_87, %c0_88] : memref<64x128xf32, #tpu.memory_space<vmem>>, vector<8x128xf32>
    %c0_89 = arith.constant 0 : index
    %c0_90 = arith.constant 0 : index
    %75 = vector.load %arg5[%c0_89, %c0_90] : memref<128x128xf32, #tpu.memory_space<vmem>>, vector<128x128xf32>
    %cst_91 = arith.constant dense<0.000000e+00> : vector<8x128xf32>
    %76 = tpu.matmul %72, %75, %cst_91 {dimension_numbers = #tpu.dot_dimension_numbers<[1], [0], [0], [1], [0, 0, 1, 1], [], []>} : vector<8x128xf32>, vector<128x128xf32>, vector<8x128xf32> -> vector<8x128xf32>
    %77 = arith.addf %74, %76 : vector<8x128xf32>
    %c24_92 = arith.constant 24 : index
    %c0_93 = arith.constant 0 : index
    %78 = vector.load %arg14[%c24_92, %c0_93] : memref<64x128xf32, #tpu.memory_space<vmem>>, vector<8x128xf32>
    tpu.vector_store %arg14[%c24_92, %c0_93], %77 {strides = array<i32>} : memref<64x128xf32, #tpu.memory_space<vmem>>, vector<8x128xf32>,
    %c32 = arith.constant 32 : index
    %c0_94 = arith.constant 0 : index
    %79 = vector.load %arg14[%c32, %c0_94] : memref<64x128xf32, #tpu.memory_space<vmem>>, vector<8x128xf32>
    %c0_95 = arith.constant 0 : index
    %c0_96 = arith.constant 0 : index
    %80 = vector.load %arg6[%c0_95, %c0_96] : memref<128x128xf32, #tpu.memory_space<vmem>>, vector<128x128xf32>
    %cst_97 = arith.constant dense<0.000000e+00> : vector<8x128xf32>
    %81 = tpu.matmul %72, %80, %cst_97 {dimension_numbers = #tpu.dot_dimension_numbers<[1], [0], [0], [1], [0, 0, 1, 1], [], []>} : vector<8x128xf32>, vector<128x128xf32>, vector<8x128xf32> -> vector<8x128xf32>
    %82 = arith.addf %79, %81 : vector<8x128xf32>
    %c32_98 = arith.constant 32 : index
    %c0_99 = arith.constant 0 : index
    %83 = vector.load %arg14[%c32_98, %c0_99] : memref<64x128xf32, #tpu.memory_space<vmem>>, vector<8x128xf32>
    tpu.vector_store %arg14[%c32_98, %c0_99], %82 {strides = array<i32>} : memref<64x128xf32, #tpu.memory_space<vmem>>, vector<8x128xf32>,
    %c32_100 = arith.constant 32 : index
    %c0_101 = arith.constant 0 : index
    %84 = vector.load %arg13[%c32_100, %c0_101] : memref<64x128xf32, #tpu.memory_space<vmem>>, vector<8x128xf32>
    %c0_102 = arith.constant 0 : index
    %c0_103 = arith.constant 0 : index
    %85 = vector.load %arg15[%c0_102, %c0_103] : memref<8x128xf32, #tpu.memory_space<vmem>>, vector<8x128xf32>
    %c0_104 = arith.constant 0 : index
    %c0_105 = arith.constant 0 : index
    %86 = vector.load %arg2[%c0_104, %c0_105] : memref<128x128xf32, #tpu.memory_space<vmem>>, vector<128x128xf32>
    %cst_106 = arith.constant dense<0.000000e+00> : vector<8x128xf32>
    %87 = tpu.matmul %85, %86, %cst_106 {dimension_numbers = #tpu.dot_dimension_numbers<[1], [0], [0], [1], [0, 0, 1, 1], [], []>} : vector<8x128xf32>, vector<128x128xf32>, vector<8x128xf32> -> vector<8x128xf32>
    %88 = arith.addf %84, %87 : vector<8x128xf32>
    %89 = math.tanh %88 : vector<8x128xf32>
    %c0_107 = arith.constant 0 : index
    %c0_108 = arith.constant 0 : index
    %90 = vector.load %arg15[%c0_107, %c0_108] : memref<8x128xf32, #tpu.memory_space<vmem>>, vector<8x128xf32>
    tpu.vector_store %arg15[%c0_107, %c0_108], %89 {strides = array<i32>} : memref<8x128xf32, #tpu.memory_space<vmem>>, vector<8x128xf32>,
    %c32_109 = arith.constant 32 : index
    %c0_110 = arith.constant 0 : index
    %91 = vector.load %arg14[%c32_109, %c0_110] : memref<64x128xf32, #tpu.memory_space<vmem>>, vector<8x128xf32>
    %c0_111 = arith.constant 0 : index
    %c0_112 = arith.constant 0 : index
    %92 = vector.load %arg5[%c0_111, %c0_112] : memref<128x128xf32, #tpu.memory_space<vmem>>, vector<128x128xf32>
    %cst_113 = arith.constant dense<0.000000e+00> : vector<8x128xf32>
    %93 = tpu.matmul %89, %92, %cst_113 {dimension_numbers = #tpu.dot_dimension_numbers<[1], [0], [0], [1], [0, 0, 1, 1], [], []>} : vector<8x128xf32>, vector<128x128xf32>, vector<8x128xf32> -> vector<8x128xf32>
    %94 = arith.addf %91, %93 : vector<8x128xf32>
    %c32_114 = arith.constant 32 : index
    %c0_115 = arith.constant 0 : index
    %95 = vector.load %arg14[%c32_114, %c0_115] : memref<64x128xf32, #tpu.memory_space<vmem>>, vector<8x128xf32>
    tpu.vector_store %arg14[%c32_114, %c0_115], %94 {strides = array<i32>} : memref<64x128xf32, #tpu.memory_space<vmem>>, vector<8x128xf32>,
    %c24_116 = arith.constant 24 : index
    %c0_117 = arith.constant 0 : index
    %96 = vector.load %arg14[%c24_116, %c0_117] : memref<64x128xf32, #tpu.memory_space<vmem>>, vector<8x128xf32>
    %c0_118 = arith.constant 0 : index
    %c0_119 = arith.constant 0 : index
    %97 = vector.load %arg6[%c0_118, %c0_119] : memref<128x128xf32, #tpu.memory_space<vmem>>, vector<128x128xf32>
    %cst_120 = arith.constant dense<0.000000e+00> : vector<8x128xf32>
    %98 = tpu.matmul %89, %97, %cst_120 {dimension_numbers = #tpu.dot_dimension_numbers<[1], [0], [0], [1], [0, 0, 1, 1], [], []>} : vector<8x128xf32>, vector<128x128xf32>, vector<8x128xf32> -> vector<8x128xf32>
    %99 = arith.addf %96, %98 : vector<8x128xf32>
    %c24_121 = arith.constant 24 : index
    %c0_122 = arith.constant 0 : index
    %100 = vector.load %arg14[%c24_121, %c0_122] : memref<64x128xf32, #tpu.memory_space<vmem>>, vector<8x128xf32>
    tpu.vector_store %arg14[%c24_121, %c0_122], %99 {strides = array<i32>} : memref<64x128xf32, #tpu.memory_space<vmem>>, vector<8x128xf32>,
    %c40_123 = arith.constant 40 : index
    %c0_124 = arith.constant 0 : index
    %101 = vector.load %arg13[%c40_123, %c0_124] : memref<64x128xf32, #tpu.memory_space<vmem>>, vector<8x128xf32>
    %c0_125 = arith.constant 0 : index
    %c0_126 = arith.constant 0 : index
    %102 = vector.load %arg15[%c0_125, %c0_126] : memref<8x128xf32, #tpu.memory_space<vmem>>, vector<8x128xf32>
    %c0_127 = arith.constant 0 : index
    %c0_128 = arith.constant 0 : index
    %103 = vector.load %arg2[%c0_127, %c0_128] : memref<128x128xf32, #tpu.memory_space<vmem>>, vector<128x128xf32>
    %cst_129 = arith.constant dense<0.000000e+00> : vector<8x128xf32>
    %104 = tpu.matmul %102, %103, %cst_129 {dimension_numbers = #tpu.dot_dimension_numbers<[1], [0], [0], [1], [0, 0, 1, 1], [], []>} : vector<8x128xf32>, vector<128x128xf32>, vector<8x128xf32> -> vector<8x128xf32>
    %105 = arith.addf %101, %104 : vector<8x128xf32>
    %106 = math.tanh %105 : vector<8x128xf32>
    %c0_130 = arith.constant 0 : index
    %c0_131 = arith.constant 0 : index
    %107 = vector.load %arg15[%c0_130, %c0_131] : memref<8x128xf32, #tpu.memory_space<vmem>>, vector<8x128xf32>
    tpu.vector_store %arg15[%c0_130, %c0_131], %106 {strides = array<i32>} : memref<8x128xf32, #tpu.memory_space<vmem>>, vector<8x128xf32>,
    %c40_132 = arith.constant 40 : index
    %c0_133 = arith.constant 0 : index
    %108 = vector.load %arg14[%c40_132, %c0_133] : memref<64x128xf32, #tpu.memory_space<vmem>>, vector<8x128xf32>
    %c0_134 = arith.constant 0 : index
    %c0_135 = arith.constant 0 : index
    %109 = vector.load %arg5[%c0_134, %c0_135] : memref<128x128xf32, #tpu.memory_space<vmem>>, vector<128x128xf32>
    %cst_136 = arith.constant dense<0.000000e+00> : vector<8x128xf32>
    %110 = tpu.matmul %106, %109, %cst_136 {dimension_numbers = #tpu.dot_dimension_numbers<[1], [0], [0], [1], [0, 0, 1, 1], [], []>} : vector<8x128xf32>, vector<128x128xf32>, vector<8x128xf32> -> vector<8x128xf32>
    %111 = arith.addf %108, %110 : vector<8x128xf32>
    %c40_137 = arith.constant 40 : index
    %c0_138 = arith.constant 0 : index
    %112 = vector.load %arg14[%c40_137, %c0_138] : memref<64x128xf32, #tpu.memory_space<vmem>>, vector<8x128xf32>
    tpu.vector_store %arg14[%c40_137, %c0_138], %111 {strides = array<i32>} : memref<64x128xf32, #tpu.memory_space<vmem>>, vector<8x128xf32>,
    %c16_139 = arith.constant 16 : index
    %c0_140 = arith.constant 0 : index
    %113 = vector.load %arg14[%c16_139, %c0_140] : memref<64x128xf32, #tpu.memory_space<vmem>>, vector<8x128xf32>
    %c0_141 = arith.constant 0 : index
    %c0_142 = arith.constant 0 : index
    %114 = vector.load %arg6[%c0_141, %c0_142] : memref<128x128xf32, #tpu.memory_space<vmem>>, vector<128x128xf32>
    %cst_143 = arith.constant dense<0.000000e+00> : vector<8x128xf32>
    %115 = tpu.matmul %106, %114, %cst_143 {dimension_numbers = #tpu.dot_dimension_numbers<[1], [0], [0], [1], [0, 0, 1, 1], [], []>} : vector<8x128xf32>, vector<128x128xf32>, vector<8x128xf32> -> vector<8x128xf32>
    %116 = arith.addf %113, %115 : vector<8x128xf32>
    %c16_144 = arith.constant 16 : index
    %c0_145 = arith.constant 0 : index
    %117 = vector.load %arg14[%c16_144, %c0_145] : memref<64x128xf32, #tpu.memory_space<vmem>>, vector<8x128xf32>
    tpu.vector_store %arg14[%c16_144, %c0_145], %116 {strides = array<i32>} : memref<64x128xf32, #tpu.memory_space<vmem>>, vector<8x128xf32>,
    %c48_146 = arith.constant 48 : index
    %c0_147 = arith.constant 0 : index
    %118 = vector.load %arg13[%c48_146, %c0_147] : memref<64x128xf32, #tpu.memory_space<vmem>>, vector<8x128xf32>
    %c0_148 = arith.constant 0 : index
    %c0_149 = arith.constant 0 : index
    %119 = vector.load %arg15[%c0_148, %c0_149] : memref<8x128xf32, #tpu.memory_space<vmem>>, vector<8x128xf32>
    %c0_150 = arith.constant 0 : index
    %c0_151 = arith.constant 0 : index
    %120 = vector.load %arg2[%c0_150, %c0_151] : memref<128x128xf32, #tpu.memory_space<vmem>>, vector<128x128xf32>
    %cst_152 = arith.constant dense<0.000000e+00> : vector<8x128xf32>
    %121 = tpu.matmul %119, %120, %cst_152 {dimension_numbers = #tpu.dot_dimension_numbers<[1], [0], [0], [1], [0, 0, 1, 1], [], []>} : vector<8x128xf32>, vector<128x128xf32>, vector<8x128xf32> -> vector<8x128xf32>
    %122 = arith.addf %118, %121 : vector<8x128xf32>
    %123 = math.tanh %122 : vector<8x128xf32>
    %c0_153 = arith.constant 0 : index
    %c0_154 = arith.constant 0 : index
    %124 = vector.load %arg15[%c0_153, %c0_154] : memref<8x128xf32, #tpu.memory_space<vmem>>, vector<8x128xf32>
    tpu.vector_store %arg15[%c0_153, %c0_154], %123 {strides = array<i32>} : memref<8x128xf32, #tpu.memory_space<vmem>>, vector<8x128xf32>,
    %c48_155 = arith.constant 48 : index
    %c0_156 = arith.constant 0 : index
    %125 = vector.load %arg14[%c48_155, %c0_156] : memref<64x128xf32, #tpu.memory_space<vmem>>, vector<8x128xf32>
    %c0_157 = arith.constant 0 : index
    %c0_158 = arith.constant 0 : index
    %126 = vector.load %arg5[%c0_157, %c0_158] : memref<128x128xf32, #tpu.memory_space<vmem>>, vector<128x128xf32>
    %cst_159 = arith.constant dense<0.000000e+00> : vector<8x128xf32>
    %127 = tpu.matmul %123, %126, %cst_159 {dimension_numbers = #tpu.dot_dimension_numbers<[1], [0], [0], [1], [0, 0, 1, 1], [], []>} : vector<8x128xf32>, vector<128x128xf32>, vector<8x128xf32> -> vector<8x128xf32>
    %128 = arith.addf %125, %127 : vector<8x128xf32>
    %c48_160 = arith.constant 48 : index
    %c0_161 = arith.constant 0 : index
    %129 = vector.load %arg14[%c48_160, %c0_161] : memref<64x128xf32, #tpu.memory_space<vmem>>, vector<8x128xf32>
    tpu.vector_store %arg14[%c48_160, %c0_161], %128 {strides = array<i32>} : memref<64x128xf32, #tpu.memory_space<vmem>>, vector<8x128xf32>,
    %c8_162 = arith.constant 8 : index
    %c0_163 = arith.constant 0 : index
    %130 = vector.load %arg14[%c8_162, %c0_163] : memref<64x128xf32, #tpu.memory_space<vmem>>, vector<8x128xf32>
    %c0_164 = arith.constant 0 : index
    %c0_165 = arith.constant 0 : index
    %131 = vector.load %arg6[%c0_164, %c0_165] : memref<128x128xf32, #tpu.memory_space<vmem>>, vector<128x128xf32>
    %cst_166 = arith.constant dense<0.000000e+00> : vector<8x128xf32>
    %132 = tpu.matmul %123, %131, %cst_166 {dimension_numbers = #tpu.dot_dimension_numbers<[1], [0], [0], [1], [0, 0, 1, 1], [], []>} : vector<8x128xf32>, vector<128x128xf32>, vector<8x128xf32> -> vector<8x128xf32>
    %133 = arith.addf %130, %132 : vector<8x128xf32>
    %c8_167 = arith.constant 8 : index
    %c0_168 = arith.constant 0 : index
    %134 = vector.load %arg14[%c8_167, %c0_168] : memref<64x128xf32, #tpu.memory_space<vmem>>, vector<8x128xf32>
    tpu.vector_store %arg14[%c8_167, %c0_168], %133 {strides = array<i32>} : memref<64x128xf32, #tpu.memory_space<vmem>>, vector<8x128xf32>,
    %c56_169 = arith.constant 56 : index
    %c0_170 = arith.constant 0 : index
    %135 = vector.load %arg13[%c56_169, %c0_170] : memref<64x128xf32, #tpu.memory_space<vmem>>, vector<8x128xf32>
    %c0_171 = arith.constant 0 : index
    %c0_172 = arith.constant 0 : index
    %136 = vector.load %arg15[%c0_171, %c0_172] : memref<8x128xf32, #tpu.memory_space<vmem>>, vector<8x128xf32>
    %c0_173 = arith.constant 0 : index
    %c0_174 = arith.constant 0 : index
    %137 = vector.load %arg2[%c0_173, %c0_174] : memref<128x128xf32, #tpu.memory_space<vmem>>, vector<128x128xf32>
    %cst_175 = arith.constant dense<0.000000e+00> : vector<8x128xf32>
    %138 = tpu.matmul %136, %137, %cst_175 {dimension_numbers = #tpu.dot_dimension_numbers<[1], [0], [0], [1], [0, 0, 1, 1], [], []>} : vector<8x128xf32>, vector<128x128xf32>, vector<8x128xf32> -> vector<8x128xf32>
    %139 = arith.addf %135, %138 : vector<8x128xf32>
    %140 = math.tanh %139 : vector<8x128xf32>
    %c0_176 = arith.constant 0 : index
    %c0_177 = arith.constant 0 : index
    %141 = vector.load %arg15[%c0_176, %c0_177] : memref<8x128xf32, #tpu.memory_space<vmem>>, vector<8x128xf32>
    tpu.vector_store %arg15[%c0_176, %c0_177], %140 {strides = array<i32>} : memref<8x128xf32, #tpu.memory_space<vmem>>, vector<8x128xf32>,
    %c56_178 = arith.constant 56 : index
    %c0_179 = arith.constant 0 : index
    %142 = vector.load %arg14[%c56_178, %c0_179] : memref<64x128xf32, #tpu.memory_space<vmem>>, vector<8x128xf32>
    %c0_180 = arith.constant 0 : index
    %c0_181 = arith.constant 0 : index
    %143 = vector.load %arg5[%c0_180, %c0_181] : memref<128x128xf32, #tpu.memory_space<vmem>>, vector<128x128xf32>
    %cst_182 = arith.constant dense<0.000000e+00> : vector<8x128xf32>
    %144 = tpu.matmul %140, %143, %cst_182 {dimension_numbers = #tpu.dot_dimension_numbers<[1], [0], [0], [1], [0, 0, 1, 1], [], []>} : vector<8x128xf32>, vector<128x128xf32>, vector<8x128xf32> -> vector<8x128xf32>
    %145 = arith.addf %142, %144 : vector<8x128xf32>
    %c56_183 = arith.constant 56 : index
    %c0_184 = arith.constant 0 : index
    %146 = vector.load %arg14[%c56_183, %c0_184] : memref<64x128xf32, #tpu.memory_space<vmem>>, vector<8x128xf32>
    tpu.vector_store %arg14[%c56_183, %c0_184], %145 {strides = array<i32>} : memref<64x128xf32, #tpu.memory_space<vmem>>, vector<8x128xf32>,
    %c0_185 = arith.constant 0 : index
    %c0_186 = arith.constant 0 : index
    %147 = vector.load %arg14[%c0_185, %c0_186] : memref<64x128xf32, #tpu.memory_space<vmem>>, vector<8x128xf32>
    %c0_187 = arith.constant 0 : index
    %c0_188 = arith.constant 0 : index
    %148 = vector.load %arg6[%c0_187, %c0_188] : memref<128x128xf32, #tpu.memory_space<vmem>>, vector<128x128xf32>
    %cst_189 = arith.constant dense<0.000000e+00> : vector<8x128xf32>
    %149 = tpu.matmul %140, %148, %cst_189 {dimension_numbers = #tpu.dot_dimension_numbers<[1], [0], [0], [1], [0, 0, 1, 1], [], []>} : vector<8x128xf32>, vector<128x128xf32>, vector<8x128xf32> -> vector<8x128xf32>
    %150 = arith.addf %147, %149 : vector<8x128xf32>
    %c0_190 = arith.constant 0 : index
    %c0_191 = arith.constant 0 : index
    %151 = vector.load %arg14[%c0_190, %c0_191] : memref<64x128xf32, #tpu.memory_space<vmem>>, vector<8x128xf32>
    tpu.vector_store %arg14[%c0_190, %c0_191], %150 {strides = array<i32>} : memref<64x128xf32, #tpu.memory_space<vmem>>, vector<8x128xf32>,
    %c0_192 = arith.constant 0 : index
    %c0_193 = arith.constant 0 : index
    %152 = vector.load %arg15[%c0_192, %c0_193] : memref<8x128xf32, #tpu.memory_space<vmem>>, vector<8x128xf32>
    %c0_194 = arith.constant 0 : index
    %c0_195 = arith.constant 0 : index
    %153 = vector.load %arg11[%c0_194, %c0_195] : memref<8x128xf32, #tpu.memory_space<vmem>>, vector<8x128xf32>
    tpu.vector_store %arg11[%c0_194, %c0_195], %152 {strides = array<i32>} : memref<8x128xf32, #tpu.memory_space<vmem>>, vector<8x128xf32>,
    %c0_196 = arith.constant 0 : index
    %c0_197 = arith.constant 0 : index
    %154 = vector.load %arg9[%c0_196, %c0_197] : memref<8x128xf32, #tpu.memory_space<vmem>>, vector<8x128xf32>
    %c0_198 = arith.constant 0 : index
    %c0_199 = arith.constant 0 : index
    %155 = vector.load %arg15[%c0_198, %c0_199] : memref<8x128xf32, #tpu.memory_space<vmem>>, vector<8x128xf32>
    tpu.vector_store %arg15[%c0_198, %c0_199], %154 {strides = array<i32>} : memref<8x128xf32, #tpu.memory_space<vmem>>, vector<8x128xf32>,
    %c0_200 = arith.constant 0 : index
    %c0_201 = arith.constant 0 : index
    %156 = vector.load %arg14[%c0_200, %c0_201] : memref<64x128xf32, #tpu.memory_space<vmem>>, vector<8x128xf32>
    %c0_202 = arith.constant 0 : index
    %c0_203 = arith.constant 0 : index
    %157 = vector.load %arg15[%c0_202, %c0_203] : memref<8x128xf32, #tpu.memory_space<vmem>>, vector<8x128xf32>
    %c0_204 = arith.constant 0 : index
    %c0_205 = arith.constant 0 : index
    %158 = vector.load %arg7[%c0_204, %c0_205] : memref<128x128xf32, #tpu.memory_space<vmem>>, vector<128x128xf32>
    %cst_206 = arith.constant dense<0.000000e+00> : vector<8x128xf32>
    %159 = tpu.matmul %157, %158, %cst_206 {dimension_numbers = #tpu.dot_dimension_numbers<[1], [0], [0], [1], [0, 0, 1, 1], [], []>} : vector<8x128xf32>, vector<128x128xf32>, vector<8x128xf32> -> vector<8x128xf32>
    %160 = arith.addf %156, %159 : vector<8x128xf32>
    %161 = math.tanh %160 : vector<8x128xf32>
    %c0_207 = arith.constant 0 : index
    %c0_208 = arith.constant 0 : index
    %162 = vector.load %arg15[%c0_207, %c0_208] : memref<8x128xf32, #tpu.memory_space<vmem>>, vector<8x128xf32>
    tpu.vector_store %arg15[%c0_207, %c0_208], %161 {strides = array<i32>} : memref<8x128xf32, #tpu.memory_space<vmem>>, vector<8x128xf32>,
    %c0_209 = arith.constant 0 : index
    %c0_210 = arith.constant 0 : index
    %163 = vector.load %arg10[%c0_209, %c0_210] : memref<64x128xf32, #tpu.memory_space<vmem>>, vector<8x128xf32>
    %164 = arith.select %2, %161, %163 : vector<8x128xi1>, vector<8x128xf32>
    %c0_211 = arith.constant 0 : index
    %c0_212 = arith.constant 0 : index
    %165 = vector.load %arg10[%c0_211, %c0_212] : memref<64x128xf32, #tpu.memory_space<vmem>>, vector<8x128xf32>
    tpu.vector_store %arg10[%c0_211, %c0_212], %164 {strides = array<i32>} : memref<64x128xf32, #tpu.memory_space<vmem>>, vector<8x128xf32>,
    %c56_213 = arith.constant 56 : index
    %c0_214 = arith.constant 0 : index
    %166 = vector.load %arg10[%c56_213, %c0_214] : memref<64x128xf32, #tpu.memory_space<vmem>>, vector<8x128xf32>
    %167 = arith.select %2, %166, %161 : vector<8x128xi1>, vector<8x128xf32>
    %c56_215 = arith.constant 56 : index
    %c0_216 = arith.constant 0 : index
    %168 = vector.load %arg10[%c56_215, %c0_216] : memref<64x128xf32, #tpu.memory_space<vmem>>, vector<8x128xf32>
    tpu.vector_store %arg10[%c56_215, %c0_216], %167 {strides = array<i32>} : memref<64x128xf32, #tpu.memory_space<vmem>>, vector<8x128xf32>,
    %c8_217 = arith.constant 8 : index
    %c0_218 = arith.constant 0 : index
    %169 = vector.load %arg14[%c8_217, %c0_218] : memref<64x128xf32, #tpu.memory_space<vmem>>, vector<8x128xf32>
    %c0_219 = arith.constant 0 : index
    %c0_220 = arith.constant 0 : index
    %170 = vector.load %arg15[%c0_219, %c0_220] : memref<8x128xf32, #tpu.memory_space<vmem>>, vector<8x128xf32>
    %c0_221 = arith.constant 0 : index
    %c0_222 = arith.constant 0 : index
    %171 = vector.load %arg7[%c0_221, %c0_222] : memref<128x128xf32, #tpu.memory_space<vmem>>, vector<128x128xf32>
    %cst_223 = arith.constant dense<0.000000e+00> : vector<8x128xf32>
    %172 = tpu.matmul %170, %171, %cst_223 {dimension_numbers = #tpu.dot_dimension_numbers<[1], [0], [0], [1], [0, 0, 1, 1], [], []>} : vector<8x128xf32>, vector<128x128xf32>, vector<8x128xf32> -> vector<8x128xf32>
    %173 = arith.addf %169, %172 : vector<8x128xf32>
    %174 = math.tanh %173 : vector<8x128xf32>
    %c0_224 = arith.constant 0 : index
    %c0_225 = arith.constant 0 : index
    %175 = vector.load %arg15[%c0_224, %c0_225] : memref<8x128xf32, #tpu.memory_space<vmem>>, vector<8x128xf32>
    tpu.vector_store %arg15[%c0_224, %c0_225], %174 {strides = array<i32>} : memref<8x128xf32, #tpu.memory_space<vmem>>, vector<8x128xf32>,
    %c8_226 = arith.constant 8 : index
    %c0_227 = arith.constant 0 : index
    %176 = vector.load %arg10[%c8_226, %c0_227] : memref<64x128xf32, #tpu.memory_space<vmem>>, vector<8x128xf32>
    %177 = arith.select %2, %174, %176 : vector<8x128xi1>, vector<8x128xf32>
    %c8_228 = arith.constant 8 : index
    %c0_229 = arith.constant 0 : index
    %178 = vector.load %arg10[%c8_228, %c0_229] : memref<64x128xf32, #tpu.memory_space<vmem>>, vector<8x128xf32>
    tpu.vector_store %arg10[%c8_228, %c0_229], %177 {strides = array<i32>} : memref<64x128xf32, #tpu.memory_space<vmem>>, vector<8x128xf32>,
    %c48_230 = arith.constant 48 : index
    %c0_231 = arith.constant 0 : index
    %179 = vector.load %arg10[%c48_230, %c0_231] : memref<64x128xf32, #tpu.memory_space<vmem>>, vector<8x128xf32>
    %180 = arith.select %2, %179, %174 : vector<8x128xi1>, vector<8x128xf32>
    %c48_232 = arith.constant 48 : index
    %c0_233 = arith.constant 0 : index
    %181 = vector.load %arg10[%c48_232, %c0_233] : memref<64x128xf32, #tpu.memory_space<vmem>>, vector<8x128xf32>
    tpu.vector_store %arg10[%c48_232, %c0_233], %180 {strides = array<i32>} : memref<64x128xf32, #tpu.memory_space<vmem>>, vector<8x128xf32>,
    %c16_234 = arith.constant 16 : index
    %c0_235 = arith.constant 0 : index
    %182 = vector.load %arg14[%c16_234, %c0_235] : memref<64x128xf32, #tpu.memory_space<vmem>>, vector<8x128xf32>
    %c0_236 = arith.constant 0 : index
    %c0_237 = arith.constant 0 : index
    %183 = vector.load %arg15[%c0_236, %c0_237] : memref<8x128xf32, #tpu.memory_space<vmem>>, vector<8x128xf32>
    %c0_238 = arith.constant 0 : index
    %c0_239 = arith.constant 0 : index
    %184 = vector.load %arg7[%c0_238, %c0_239] : memref<128x128xf32, #tpu.memory_space<vmem>>, vector<128x128xf32>
    %cst_240 = arith.constant dense<0.000000e+00> : vector<8x128xf32>
    %185 = tpu.matmul %183, %184, %cst_240 {dimension_numbers = #tpu.dot_dimension_numbers<[1], [0], [0], [1], [0, 0, 1, 1], [], []>} : vector<8x128xf32>, vector<128x128xf32>, vector<8x128xf32> -> vector<8x128xf32>
    %186 = arith.addf %182, %185 : vector<8x128xf32>
    %187 = math.tanh %186 : vector<8x128xf32>
    %c0_241 = arith.constant 0 : index
    %c0_242 = arith.constant 0 : index
    %188 = vector.load %arg15[%c0_241, %c0_242] : memref<8x128xf32, #tpu.memory_space<vmem>>, vector<8x128xf32>
    tpu.vector_store %arg15[%c0_241, %c0_242], %187 {strides = array<i32>} : memref<8x128xf32, #tpu.memory_space<vmem>>, vector<8x128xf32>,
    %c16_243 = arith.constant 16 : index
    %c0_244 = arith.constant 0 : index
    %189 = vector.load %arg10[%c16_243, %c0_244] : memref<64x128xf32, #tpu.memory_space<vmem>>, vector<8x128xf32>
    %190 = arith.select %2, %187, %189 : vector<8x128xi1>, vector<8x128xf32>
    %c16_245 = arith.constant 16 : index
    %c0_246 = arith.constant 0 : index
    %191 = vector.load %arg10[%c16_245, %c0_246] : memref<64x128xf32, #tpu.memory_space<vmem>>, vector<8x128xf32>
    tpu.vector_store %arg10[%c16_245, %c0_246], %190 {strides = array<i32>} : memref<64x128xf32, #tpu.memory_space<vmem>>, vector<8x128xf32>,
    %c40_247 = arith.constant 40 : index
    %c0_248 = arith.constant 0 : index
    %192 = vector.load %arg10[%c40_247, %c0_248] : memref<64x128xf32, #tpu.memory_space<vmem>>, vector<8x128xf32>
    %193 = arith.select %2, %192, %187 : vector<8x128xi1>, vector<8x128xf32>
    %c40_249 = arith.constant 40 : index
    %c0_250 = arith.constant 0 : index
    %194 = vector.load %arg10[%c40_249, %c0_250] : memref<64x128xf32, #tpu.memory_space<vmem>>, vector<8x128xf32>
    tpu.vector_store %arg10[%c40_249, %c0_250], %193 {strides = array<i32>} : memref<64x128xf32, #tpu.memory_space<vmem>>, vector<8x128xf32>,
    %c24_251 = arith.constant 24 : index
    %c0_252 = arith.constant 0 : index
    %195 = vector.load %arg14[%c24_251, %c0_252] : memref<64x128xf32, #tpu.memory_space<vmem>>, vector<8x128xf32>
    %c0_253 = arith.constant 0 : index
    %c0_254 = arith.constant 0 : index
    %196 = vector.load %arg15[%c0_253, %c0_254] : memref<8x128xf32, #tpu.memory_space<vmem>>, vector<8x128xf32>
    %c0_255 = arith.constant 0 : index
    %c0_256 = arith.constant 0 : index
    %197 = vector.load %arg7[%c0_255, %c0_256] : memref<128x128xf32, #tpu.memory_space<vmem>>, vector<128x128xf32>
    %cst_257 = arith.constant dense<0.000000e+00> : vector<8x128xf32>
    %198 = tpu.matmul %196, %197, %cst_257 {dimension_numbers = #tpu.dot_dimension_numbers<[1], [0], [0], [1], [0, 0, 1, 1], [], []>} : vector<8x128xf32>, vector<128x128xf32>, vector<8x128xf32> -> vector<8x128xf32>
    %199 = arith.addf %195, %198 : vector<8x128xf32>
    %200 = math.tanh %199 : vector<8x128xf32>
    %c0_258 = arith.constant 0 : index
    %c0_259 = arith.constant 0 : index
    %201 = vector.load %arg15[%c0_258, %c0_259] : memref<8x128xf32, #tpu.memory_space<vmem>>, vector<8x128xf32>
    tpu.vector_store %arg15[%c0_258, %c0_259], %200 {strides = array<i32>} : memref<8x128xf32, #tpu.memory_space<vmem>>, vector<8x128xf32>,
    %c24_260 = arith.constant 24 : index
    %c0_261 = arith.constant 0 : index
    %202 = vector.load %arg10[%c24_260, %c0_261] : memref<64x128xf32, #tpu.memory_space<vmem>>, vector<8x128xf32>
    %203 = arith.select %2, %200, %202 : vector<8x128xi1>, vector<8x128xf32>
    %c24_262 = arith.constant 24 : index
    %c0_263 = arith.constant 0 : index
    %204 = vector.load %arg10[%c24_262, %c0_263] : memref<64x128xf32, #tpu.memory_space<vmem>>, vector<8x128xf32>
    tpu.vector_store %arg10[%c24_262, %c0_263], %203 {strides = array<i32>} : memref<64x128xf32, #tpu.memory_space<vmem>>, vector<8x128xf32>,
    %c32_264 = arith.constant 32 : index
    %c0_265 = arith.constant 0 : index
    %205 = vector.load %arg10[%c32_264, %c0_265] : memref<64x128xf32, #tpu.memory_space<vmem>>, vector<8x128xf32>
    %206 = arith.select %2, %205, %200 : vector<8x128xi1>, vector<8x128xf32>
    %c32_266 = arith.constant 32 : index
    %c0_267 = arith.constant 0 : index
    %207 = vector.load %arg10[%c32_266, %c0_267] : memref<64x128xf32, #tpu.memory_space<vmem>>, vector<8x128xf32>
    tpu.vector_store %arg10[%c32_266, %c0_267], %206 {strides = array<i32>} : memref<64x128xf32, #tpu.memory_space<vmem>>, vector<8x128xf32>,
    %c32_268 = arith.constant 32 : index
    %c0_269 = arith.constant 0 : index
    %208 = vector.load %arg14[%c32_268, %c0_269] : memref<64x128xf32, #tpu.memory_space<vmem>>, vector<8x128xf32>
    %c0_270 = arith.constant 0 : index
    %c0_271 = arith.constant 0 : index
    %209 = vector.load %arg15[%c0_270, %c0_271] : memref<8x128xf32, #tpu.memory_space<vmem>>, vector<8x128xf32>
    %c0_272 = arith.constant 0 : index
    %c0_273 = arith.constant 0 : index
    %210 = vector.load %arg7[%c0_272, %c0_273] : memref<128x128xf32, #tpu.memory_space<vmem>>, vector<128x128xf32>
    %cst_274 = arith.constant dense<0.000000e+00> : vector<8x128xf32>
    %211 = tpu.matmul %209, %210, %cst_274 {dimension_numbers = #tpu.dot_dimension_numbers<[1], [0], [0], [1], [0, 0, 1, 1], [], []>} : vector<8x128xf32>, vector<128x128xf32>, vector<8x128xf32> -> vector<8x128xf32>
    %212 = arith.addf %208, %211 : vector<8x128xf32>
    %213 = math.tanh %212 : vector<8x128xf32>
    %c0_275 = arith.constant 0 : index
    %c0_276 = arith.constant 0 : index
    %214 = vector.load %arg15[%c0_275, %c0_276] : memref<8x128xf32, #tpu.memory_space<vmem>>, vector<8x128xf32>
    tpu.vector_store %arg15[%c0_275, %c0_276], %213 {strides = array<i32>} : memref<8x128xf32, #tpu.memory_space<vmem>>, vector<8x128xf32>,
    %c32_277 = arith.constant 32 : index
    %c0_278 = arith.constant 0 : index
    %215 = vector.load %arg10[%c32_277, %c0_278] : memref<64x128xf32, #tpu.memory_space<vmem>>, vector<8x128xf32>
    %216 = arith.select %2, %213, %215 : vector<8x128xi1>, vector<8x128xf32>
    %c32_279 = arith.constant 32 : index
    %c0_280 = arith.constant 0 : index
    %217 = vector.load %arg10[%c32_279, %c0_280] : memref<64x128xf32, #tpu.memory_space<vmem>>, vector<8x128xf32>
    tpu.vector_store %arg10[%c32_279, %c0_280], %216 {strides = array<i32>} : memref<64x128xf32, #tpu.memory_space<vmem>>, vector<8x128xf32>,
    %c24_281 = arith.constant 24 : index
    %c0_282 = arith.constant 0 : index
    %218 = vector.load %arg10[%c24_281, %c0_282] : memref<64x128xf32, #tpu.memory_space<vmem>>, vector<8x128xf32>
    %219 = arith.select %2, %218, %213 : vector<8x128xi1>, vector<8x128xf32>
    %c24_283 = arith.constant 24 : index
    %c0_284 = arith.constant 0 : index
    %220 = vector.load %arg10[%c24_283, %c0_284] : memref<64x128xf32, #tpu.memory_space<vmem>>, vector<8x128xf32>
    tpu.vector_store %arg10[%c24_283, %c0_284], %219 {strides = array<i32>} : memref<64x128xf32, #tpu.memory_space<vmem>>, vector<8x128xf32>,
    %c40_285 = arith.constant 40 : index
    %c0_286 = arith.constant 0 : index
    %221 = vector.load %arg14[%c40_285, %c0_286] : memref<64x128xf32, #tpu.memory_space<vmem>>, vector<8x128xf32>
    %c0_287 = arith.constant 0 : index
    %c0_288 = arith.constant 0 : index
    %222 = vector.load %arg15[%c0_287, %c0_288] : memref<8x128xf32, #tpu.memory_space<vmem>>, vector<8x128xf32>
    %c0_289 = arith.constant 0 : index
    %c0_290 = arith.constant 0 : index
    %223 = vector.load %arg7[%c0_289, %c0_290] : memref<128x128xf32, #tpu.memory_space<vmem>>, vector<128x128xf32>
    %cst_291 = arith.constant dense<0.000000e+00> : vector<8x128xf32>
    %224 = tpu.matmul %222, %223, %cst_291 {dimension_numbers = #tpu.dot_dimension_numbers<[1], [0], [0], [1], [0, 0, 1, 1], [], []>} : vector<8x128xf32>, vector<128x128xf32>, vector<8x128xf32> -> vector<8x128xf32>
    %225 = arith.addf %221, %224 : vector<8x128xf32>
    %226 = math.tanh %225 : vector<8x128xf32>
    %c0_292 = arith.constant 0 : index
    %c0_293 = arith.constant 0 : index
    %227 = vector.load %arg15[%c0_292, %c0_293] : memref<8x128xf32, #tpu.memory_space<vmem>>, vector<8x128xf32>
    tpu.vector_store %arg15[%c0_292, %c0_293], %226 {strides = array<i32>} : memref<8x128xf32, #tpu.memory_space<vmem>>, vector<8x128xf32>,
    %c40_294 = arith.constant 40 : index
    %c0_295 = arith.constant 0 : index
    %228 = vector.load %arg10[%c40_294, %c0_295] : memref<64x128xf32, #tpu.memory_space<vmem>>, vector<8x128xf32>
    %229 = arith.select %2, %226, %228 : vector<8x128xi1>, vector<8x128xf32>
    %c40_296 = arith.constant 40 : index
    %c0_297 = arith.constant 0 : index
    %230 = vector.load %arg10[%c40_296, %c0_297] : memref<64x128xf32, #tpu.memory_space<vmem>>, vector<8x128xf32>
    tpu.vector_store %arg10[%c40_296, %c0_297], %229 {strides = array<i32>} : memref<64x128xf32, #tpu.memory_space<vmem>>, vector<8x128xf32>,
    %c16_298 = arith.constant 16 : index
    %c0_299 = arith.constant 0 : index
    %231 = vector.load %arg10[%c16_298, %c0_299] : memref<64x128xf32, #tpu.memory_space<vmem>>, vector<8x128xf32>
    %232 = arith.select %2, %231, %226 : vector<8x128xi1>, vector<8x128xf32>
    %c16_300 = arith.constant 16 : index
    %c0_301 = arith.constant 0 : index
    %233 = vector.load %arg10[%c16_300, %c0_301] : memref<64x128xf32, #tpu.memory_space<vmem>>, vector<8x128xf32>
    tpu.vector_store %arg10[%c16_300, %c0_301], %232 {strides = array<i32>} : memref<64x128xf32, #tpu.memory_space<vmem>>, vector<8x128xf32>,
    %c48_302 = arith.constant 48 : index
    %c0_303 = arith.constant 0 : index
    %234 = vector.load %arg14[%c48_302, %c0_303] : memref<64x128xf32, #tpu.memory_space<vmem>>, vector<8x128xf32>
    %c0_304 = arith.constant 0 : index
    %c0_305 = arith.constant 0 : index
    %235 = vector.load %arg15[%c0_304, %c0_305] : memref<8x128xf32, #tpu.memory_space<vmem>>, vector<8x128xf32>
    %c0_306 = arith.constant 0 : index
    %c0_307 = arith.constant 0 : index
    %236 = vector.load %arg7[%c0_306, %c0_307] : memref<128x128xf32, #tpu.memory_space<vmem>>, vector<128x128xf32>
    %cst_308 = arith.constant dense<0.000000e+00> : vector<8x128xf32>
    %237 = tpu.matmul %235, %236, %cst_308 {dimension_numbers = #tpu.dot_dimension_numbers<[1], [0], [0], [1], [0, 0, 1, 1], [], []>} : vector<8x128xf32>, vector<128x128xf32>, vector<8x128xf32> -> vector<8x128xf32>
    %238 = arith.addf %234, %237 : vector<8x128xf32>
    %239 = math.tanh %238 : vector<8x128xf32>
    %c0_309 = arith.constant 0 : index
    %c0_310 = arith.constant 0 : index
    %240 = vector.load %arg15[%c0_309, %c0_310] : memref<8x128xf32, #tpu.memory_space<vmem>>, vector<8x128xf32>
    tpu.vector_store %arg15[%c0_309, %c0_310], %239 {strides = array<i32>} : memref<8x128xf32, #tpu.memory_space<vmem>>, vector<8x128xf32>,
    %c48_311 = arith.constant 48 : index
    %c0_312 = arith.constant 0 : index
    %241 = vector.load %arg10[%c48_311, %c0_312] : memref<64x128xf32, #tpu.memory_space<vmem>>, vector<8x128xf32>
    %242 = arith.select %2, %239, %241 : vector<8x128xi1>, vector<8x128xf32>
    %c48_313 = arith.constant 48 : index
    %c0_314 = arith.constant 0 : index
    %243 = vector.load %arg10[%c48_313, %c0_314] : memref<64x128xf32, #tpu.memory_space<vmem>>, vector<8x128xf32>
    tpu.vector_store %arg10[%c48_313, %c0_314], %242 {strides = array<i32>} : memref<64x128xf32, #tpu.memory_space<vmem>>, vector<8x128xf32>,
    %c8_315 = arith.constant 8 : index
    %c0_316 = arith.constant 0 : index
    %244 = vector.load %arg10[%c8_315, %c0_316] : memref<64x128xf32, #tpu.memory_space<vmem>>, vector<8x128xf32>
    %245 = arith.select %2, %244, %239 : vector<8x128xi1>, vector<8x128xf32>
    %c8_317 = arith.constant 8 : index
    %c0_318 = arith.constant 0 : index
    %246 = vector.load %arg10[%c8_317, %c0_318] : memref<64x128xf32, #tpu.memory_space<vmem>>, vector<8x128xf32>
    tpu.vector_store %arg10[%c8_317, %c0_318], %245 {strides = array<i32>} : memref<64x128xf32, #tpu.memory_space<vmem>>, vector<8x128xf32>,
    %c56_319 = arith.constant 56 : index
    %c0_320 = arith.constant 0 : index
    %247 = vector.load %arg14[%c56_319, %c0_320] : memref<64x128xf32, #tpu.memory_space<vmem>>, vector<8x128xf32>
    %c0_321 = arith.constant 0 : index
    %c0_322 = arith.constant 0 : index
    %248 = vector.load %arg15[%c0_321, %c0_322] : memref<8x128xf32, #tpu.memory_space<vmem>>, vector<8x128xf32>
    %c0_323 = arith.constant 0 : index
    %c0_324 = arith.constant 0 : index
    %249 = vector.load %arg7[%c0_323, %c0_324] : memref<128x128xf32, #tpu.memory_space<vmem>>, vector<128x128xf32>
    %cst_325 = arith.constant dense<0.000000e+00> : vector<8x128xf32>
    %250 = tpu.matmul %248, %249, %cst_325 {dimension_numbers = #tpu.dot_dimension_numbers<[1], [0], [0], [1], [0, 0, 1, 1], [], []>} : vector<8x128xf32>, vector<128x128xf32>, vector<8x128xf32> -> vector<8x128xf32>
    %251 = arith.addf %247, %250 : vector<8x128xf32>
    %252 = math.tanh %251 : vector<8x128xf32>
    %c0_326 = arith.constant 0 : index
    %c0_327 = arith.constant 0 : index
    %253 = vector.load %arg15[%c0_326, %c0_327] : memref<8x128xf32, #tpu.memory_space<vmem>>, vector<8x128xf32>
    tpu.vector_store %arg15[%c0_326, %c0_327], %252 {strides = array<i32>} : memref<8x128xf32, #tpu.memory_space<vmem>>, vector<8x128xf32>,
    %c56_328 = arith.constant 56 : index
    %c0_329 = arith.constant 0 : index
    %254 = vector.load %arg10[%c56_328, %c0_329] : memref<64x128xf32, #tpu.memory_space<vmem>>, vector<8x128xf32>
    %255 = arith.select %2, %252, %254 : vector<8x128xi1>, vector<8x128xf32>
    %c56_330 = arith.constant 56 : index
    %c0_331 = arith.constant 0 : index
    %256 = vector.load %arg10[%c56_330, %c0_331] : memref<64x128xf32, #tpu.memory_space<vmem>>, vector<8x128xf32>
    tpu.vector_store %arg10[%c56_330, %c0_331], %255 {strides = array<i32>} : memref<64x128xf32, #tpu.memory_space<vmem>>, vector<8x128xf32>,
    %c0_332 = arith.constant 0 : index
    %c0_333 = arith.constant 0 : index
    %257 = vector.load %arg10[%c0_332, %c0_333] : memref<64x128xf32, #tpu.memory_space<vmem>>, vector<8x128xf32>
    %258 = arith.select %2, %257, %252 : vector<8x128xi1>, vector<8x128xf32>
    %c0_334 = arith.constant 0 : index
    %c0_335 = arith.constant 0 : index
    %259 = vector.load %arg10[%c0_334, %c0_335] : memref<64x128xf32, #tpu.memory_space<vmem>>, vector<8x128xf32>
    tpu.vector_store %arg10[%c0_334, %c0_335], %258 {strides = array<i32>} : memref<64x128xf32, #tpu.memory_space<vmem>>, vector<8x128xf32>,
    %c0_336 = arith.constant 0 : index
    %c0_337 = arith.constant 0 : index
    %260 = vector.load %arg15[%c0_336, %c0_337] : memref<8x128xf32, #tpu.memory_space<vmem>>, vector<8x128xf32>
    %c0_338 = arith.constant 0 : index
    %c0_339 = arith.constant 0 : index
    %261 = vector.load %arg12[%c0_338, %c0_339] : memref<8x128xf32, #tpu.memory_space<vmem>>, vector<8x128xf32>
    tpu.vector_store %arg12[%c0_338, %c0_339], %260 {strides = array<i32>} : memref<8x128xf32, #tpu.memory_space<vmem>>, vector<8x128xf32>,
    return
  }
}

</mosaic_0001>

<bundles_post_ra>
// kernel: net_rnn_forward.1
= control target key start
LH: loop header
LB: loop body
LE: loop exit
PB: predicated region body
PF: predicated region fallthrough
CT: control target
= control target key end

     0   :  { %s2809_s1 = inlined_call_operand.vmem [shape: f32[128,128], index: 1, kind: input, shape index: {}]   ;;  %s2810_s2 = inlined_call_operand.vmem [shape: f32[128,128], index: 2, kind: input, shape index: {}]   ;;  %s2811_s5 = inlined_call_operand.vmem [shape: f32[128,128], index: 5, kind: input, shape index: {}]   ;;  %s2812_s6 = inlined_call_operand.vmem [shape: f32[128,128], index: 6, kind: input, shape index: {}]   ;;  %s2813_s3 = inlined_call_operand.vmem [shape: f32[1,128], index: 3, kind: input, shape index: {}]   ;;  %s2814_s0 = inlined_call_operand.vmem [shape: f32[64,128], index: 0, kind: input, shape index: {}]   ;;  %s2815_s4 = inlined_call_operand.vmem [shape: f32[8,128], index: 4, kind: input, shape index: {}]   ;;  %s2816_s8 = inlined_call_operand.vmem [shape: f32[1,128], index: 8, kind: input, shape index: {}]   ;;  %s2817_s7 = inlined_call_operand.vmem [shape: f32[128,128], index: 7, kind: input, shape index: {}]   ;;  %s2818_s9 = inlined_call_operand.vmem [shape: f32[8,128], index: 9, kind: input, shape index: {}]   ;;  %s2819_s11 = inlined_call_operand.vmem [shape: f32[8,128], index: 11, kind: output, shape index: {1}]   ;;  %s2820_s10 = inlined_call_operand.vmem [shape: f32[64,128], index: 10, kind: output, shape index: {0}]   ;;  %s2821_s12 = inlined_call_operand.vmem [shape: f32[8,128], index: 12, kind: output, shape index: {2}]  }
   0x1   :  { %v64_v0 = vld [vmem:[%s2809_s1 + $0x78] sm:$0xff]  ;;  %v63_v1 = vld [vmem:[%s2809_s1 + $0x70] sm:$0xff]  ;;  %v62_v4 = vld [vmem:[%s2809_s1 + $0x68] sm:$0xff] }
   0x2   :  { %v1586_v2 = vld [vmem:[%s2810_s2 + $0x78] sm:$0xff]  ;;  %69 = vmatpush.msra.mxu0 %v64_v0  ;;  %v1592_v3 = vld [vmem:[%s2810_s2 + $0x70] sm:$0xff]  ;;  %v1600_v5 = vld [vmem:[%s2810_s2 + $0x68] sm:$0xff] }
   0x3   :  { %150 = vmatpush.msra.mxu1 %v1586_v2  ;;  %v61_v6 = vld [vmem:[%s2809_s1 + $0x60] sm:$0xff]  ;;  %v60_v8 = vld [vmem:[%s2809_s1 + $0x58] sm:$0xff]  ;;  %v59_v10 = vld [vmem:[%s2809_s1 + $0x50] sm:$0xff] }
   0x4   :  { %70 = vmatpush.msra.mxu0 %v63_v1  ;;  %v1609_v7 = vld [vmem:[%s2810_s2 + $0x60] sm:$0xff]  ;;  %v1618_v9 = vld [vmem:[%s2810_s2 + $0x58] sm:$0xff]  ;;  %v1627_v11 = vld [vmem:[%s2810_s2 + $0x50] sm:$0xff] }
   0x5   :  { %151 = vmatpush.msra.mxu1 %v1592_v3  ;;  %v58_v12 = vld [vmem:[%s2809_s1 + $0x48] sm:$0xff]  ;;  %v57_v14 = vld [vmem:[%s2809_s1 + $0x40] sm:$0xff]  ;;  %v1645_v15 = vld [vmem:[%s2811_s5 + $0x78] sm:$0xff] }
   0x6   :  { %71 = vmatpush.msra.mxu0 %v62_v4  ;;  %v1636_v13 = vld [vmem:[%s2810_s2 + $0x48] sm:$0xff]  ;;  %v1650_v16 = vld [vmem:[%s2812_s6 + $0x78] sm:$0xff]  ;;  %v1655_v17 = vld [vmem:[%s2810_s2 + $0x40] sm:$0xff]  ;;  %190 = vmatpush.msra.mxu2 %v1645_v15 }
   0x7   :  { %152 = vmatpush.msra.mxu1 %v1600_v5  ;;  %229 = vmatpush.msra.mxu3 %v1650_v16  ;;  %v1662_v18 = vld [vmem:[%s2811_s5 + $0x70] sm:$0xff]  ;;  %v1673_v20 = vld [vmem:[%s2811_s5 + $0x68] sm:$0xff]  ;;  %v56_v22 = vld [vmem:[%s2809_s1 + $0x38] sm:$0xff] }
   0x8   :  { %72 = vmatpush.msra.mxu0 %v61_v6  ;;  %v1667_v19 = vld [vmem:[%s2812_s6 + $0x70] sm:$0xff]  ;;  %v1678_v21 = vld [vmem:[%s2812_s6 + $0x68] sm:$0xff]  ;;  %v1686_v23 = vld [vmem:[%s2810_s2 + $0x38] sm:$0xff]  ;;  %191 = vmatpush.msra.mxu2 %v1662_v18 }
   0x9   :  { %153 = vmatpush.msra.mxu1 %v1609_v7  ;;  %230 = vmatpush.msra.mxu3 %v1667_v19  ;;  %v1694_v24 = vld [vmem:[%s2811_s5 + $0x60] sm:$0xff]  ;;  %v55_v26 = vld [vmem:[%s2809_s1 + $0x30] sm:$0xff]  ;;  %v1715_v28 = vld [vmem:[%s2811_s5 + $0x58] sm:$0xff] }
   0xa   :  { %73 = vmatpush.msra.mxu0 %v60_v8  ;;  %v1699_v25 = vld [vmem:[%s2812_s6 + $0x60] sm:$0xff]  ;;  %v1707_v27 = vld [vmem:[%s2810_s2 + $0x30] sm:$0xff]  ;;  %192 = vmatpush.msra.mxu2 %v1673_v20  ;;  %v1720_v29 = vld [vmem:[%s2812_s6 + $0x58] sm:$0xff] }
   0xb   :  { %154 = vmatpush.msra.mxu1 %v1618_v9  ;;  %231 = vmatpush.msra.mxu3 %v1678_v21  ;;  %v54_v30 = vld [vmem:[%s2809_s1 + $0x28] sm:$0xff]  ;;  %v1736_v32 = vld [vmem:[%s2811_s5 + $0x50] sm:$0xff]  ;;  %v53_v34 = vld [vmem:[%s2809_s1 + $0x20] sm:$0xff] }
   0xc   :  { %74 = vmatpush.msra.mxu0 %v59_v10  ;;  %v1728_v31 = vld [vmem:[%s2810_s2 + $0x28] sm:$0xff]  ;;  %193 = vmatpush.msra.mxu2 %v1694_v24  ;;  %v1741_v33 = vld [vmem:[%s2812_s6 + $0x50] sm:$0xff]  ;;  %v1749_v35 = vld [vmem:[%s2810_s2 + $0x20] sm:$0xff] }
   0xd   :  { %155 = vmatpush.msra.mxu1 %v1627_v11  ;;  %232 = vmatpush.msra.mxu3 %v1699_v25  ;;  %v1757_v36 = vld [vmem:[%s2811_s5 + $0x48] sm:$0xff]  ;;  %v52_v38 = vld [vmem:[%s2809_s1 + $0x18] sm:$0xff]  ;;  %v1778_v40 = vld [vmem:[%s2811_s5 + $0x40] sm:$0xff] }
   0xe   :  { %75 = vmatpush.msra.mxu0 %v58_v12  ;;  %194 = vmatpush.msra.mxu2 %v1715_v28  ;;  %v1762_v37 = vld [vmem:[%s2812_s6 + $0x48] sm:$0xff]  ;;  %v1770_v39 = vld [vmem:[%s2810_s2 + $0x18] sm:$0xff]  ;;  %v1783_v41 = vld [vmem:[%s2812_s6 + $0x40] sm:$0xff] }
   0xf   :  { %156 = vmatpush.msra.mxu1 %v1636_v13  ;;  %233 = vmatpush.msra.mxu3 %v1720_v29  ;;  %v51_v42 = vld [vmem:[%s2809_s1 + $0x10] sm:$0xff]  ;;  %v1799_v44 = vld [vmem:[%s2811_s5 + $0x38] sm:$0xff]  ;;  %v50_v46 = vld [vmem:[%s2809_s1 + $0x8] sm:$0xff] }
  0x10   :  { %76 = vmatpush.msra.mxu0 %v57_v14  ;;  %195 = vmatpush.msra.mxu2 %v1736_v32  ;;  %v1791_v43 = vld [vmem:[%s2810_s2 + $0x10] sm:$0xff]  ;;  %v1804_v45 = vld [vmem:[%s2812_s6 + $0x38] sm:$0xff]  ;;  %v1812_v47 = vld [vmem:[%s2810_s2 + $0x8] sm:$0xff] }
  0x11   :  { %157 = vmatpush.msra.mxu1 %v1655_v17  ;;  %234 = vmatpush.msra.mxu3 %v1741_v33  ;;  %v1820_v48 = vld [vmem:[%s2811_s5 + $0x30] sm:$0xff]  ;;  %v49_v50 = vld [vmem:[%s2809_s1] sm:$0xff]  ;;  %v1902_v54 = vld [vmem:[%s2811_s5 + $0x28] sm:$0xff] }
  0x12   :  { %77 = vmatpush.msra.mxu0 %v56_v22  ;;  %196 = vmatpush.msra.mxu2 %v1757_v36  ;;  %v1825_v49 = vld [vmem:[%s2812_s6 + $0x30] sm:$0xff]  ;;  %v1833_v51 = vld [vmem:[%s2810_s2] sm:$0xff]  ;;  %v1907_v55 = vld [vmem:[%s2812_s6 + $0x28] sm:$0xff] }
  0x13   :  { %158 = vmatpush.msra.mxu1 %v1686_v23  ;;  %235 = vmatpush.msra.mxu3 %v1762_v37  ;;  %v41_v52 = vld [vmem:[%s2814_s0] sm:$0xff]  ;;  %v1928_v58 = vld [vmem:[%s2811_s5 + $0x18] sm:$0xff]  ;;  %v1942_v60 = vld [vmem:[%s2811_s5 + $0x10] sm:$0xff] }
  0x14   :  { %78 = vmatpush.msra.mxu0 %v55_v26  ;;  %197 = vmatpush.msra.mxu2 %v1778_v40  ;;  %v130_v53 = vld [vmem:[%s2815_s4] sm:$0xff]  ;;  %v1933_v59 = vld [vmem:[%s2812_s6 + $0x18] sm:$0xff]  ;;  %v1947_v61 = vld [vmem:[%s2812_s6 + $0x10] sm:$0xff] }
  0x15   :  { %159 = vmatpush.msra.mxu1 %v1707_v27  ;;  %236 = vmatpush.msra.mxu3 %v1783_v41  ;;  %v1914_v56 = vld [vmem:[%s2811_s5 + $0x20] sm:$0xff]  ;;  %v1952_v62 = vld [vmem:[%s2811_s5 + $0x8] sm:$0xff]  ;;  %v43_v6 = vld [vmem:[%s2814_s0 + $0x10] sm:$0xff] }
  0x16   :  { %79 = vmatpush.msra.mxu0 %v54_v30  ;;  %198 = vmatpush.msra.mxu2 %v1799_v44  ;;  %v1919_v57 = vld [vmem:[%s2812_s6 + $0x20] sm:$0xff]  ;;  %v1957_v63 = vld [vmem:[%s2812_s6 + $0x8] sm:$0xff]  ;;  %v44_v8 = vld [vmem:[%s2814_s0 + $0x18] sm:$0xff] }
  0x17   :  { %160 = vmatpush.msra.mxu1 %v1728_v31  ;;  %237 = vmatpush.msra.mxu3 %v1804_v45  ;;  %v42_v0 = vld [vmem:[%s2814_s0 + $0x8] sm:$0xff]  ;;  %v1969_v1 = vld [vmem:[%s2811_s5] sm:$0xff] }
  0x18   :  { %80 = vmatpush.msra.mxu0 %v53_v34  ;;  %199 = vmatpush.msra.mxu2 %v1820_v48  ;;  %v1974_v4 = vld [vmem:[%s2812_s6] sm:$0xff]  ;;  %v46_v34 = vld [vmem:[%s2814_s0 + $0x28] sm:$0xff] }
  0x19   :  { %161 = vmatpush.msra.mxu1 %v1749_v35  ;;  %238 = vmatpush.msra.mxu3 %v1825_v49  ;;  %v2012_v10 = vld [vmem:[%s2813_s3] ss:$0 sm:$0xff] }
  0x1a   :  { %81 = vmatpush.msra.mxu0 %v52_v38  ;;  %200 = vmatpush.msra.mxu2 %v1902_v54  ;;  %v45_v12 = vld [vmem:[%s2814_s0 + $0x20] sm:$0xff] }
  0x1b   :  { %162 = vmatpush.msra.mxu1 %v1770_v39  ;;  %239 = vmatpush.msra.mxu3 %v1907_v55 }
  0x1c   :  { %82 = vmatpush.msra.mxu0 %v51_v42  ;;  %201 = vmatpush.msra.mxu2 %v1914_v56  ;;  %v47_v42 = vld [vmem:[%s2814_s0 + $0x30] sm:$0xff] }
  0x1d   :  { %163 = vmatpush.msra.mxu1 %v1791_v43  ;;  %240 = vmatpush.msra.mxu3 %v1919_v57 }
  0x1e   :  { %83 = vmatpush.msra.mxu0 %v50_v46  ;;  %202 = vmatpush.msra.mxu2 %v1928_v58  ;;  %v48_v46 = vld [vmem:[%s2814_s0 + $0x38] sm:$0xff] }
  0x1f   :  { %164 = vmatpush.msra.mxu1 %v1812_v47  ;;  %241 = vmatpush.msra.mxu3 %v1933_v59 }
  0x20   :  { %84 = vmatpush.msra.mxu0 %v49_v50  ;;  %203 = vmatpush.msra.mxu2 %v1942_v60 }
  0x21   :  { %165 = vmatpush.msra.mxu1 %v1833_v51  ;;  %85 = vmatmul.f32.vlgmr.msra.gmra.mxu0 %v41_v52 }
  0x22   :  { %166 = vmatmul.f32.vlgmr.msra.gmra.mxu1 %v130_v53  ;;  %388 = vmatpush.msrb.mxu0 %v1586_v2 }
  0x23   :  { %269 = vmatpush.msrb.mxu1 %v1586_v2  ;;  %242 = vmatpush.msra.mxu3 %v1947_v61 }
  0x24   :  { %389 = vmatpush.msrb.mxu0 %v1592_v3  ;;  %204 = vmatpush.msra.mxu2 %v1952_v62 }
  0x25   :  { %270 = vmatpush.msrb.mxu1 %v1592_v3  ;;  %243 = vmatpush.msra.mxu3 %v1957_v63 }
  0x26   :  { %390 = vmatpush.msrb.mxu0 %v1600_v5  ;;  %205 = vmatpush.msra.mxu2 %v1969_v1 }
  0x27   :  { %271 = vmatpush.msrb.mxu1 %v1600_v5  ;;  %244 = vmatpush.msra.mxu3 %v1974_v4 }
  0x28   :  { %391 = vmatpush.msrb.mxu0 %v1609_v7  ;;  %309 = vmatpush.msrb.mxu2 %v1645_v15 }
  0x29   :  { %272 = vmatpush.msrb.mxu1 %v1609_v7  ;;  %88 = vmatmul.f32.gmra.mxu0 %v42_v0 }
  0x2a   :  { %392 = vmatpush.msrb.mxu0 %v1618_v9  ;;  %348 = vmatpush.msrb.mxu3 %v1650_v16 }
  0x2b   :  { %273 = vmatpush.msrb.mxu1 %v1618_v9  ;;  %310 = vmatpush.msrb.mxu2 %v1662_v18 }
  0x2c   :  { %393 = vmatpush.msrb.mxu0 %v1627_v11  ;;  %349 = vmatpush.msrb.mxu3 %v1667_v19 }
  0x2d   :  { %274 = vmatpush.msrb.mxu1 %v1627_v11  ;;  %311 = vmatpush.msrb.mxu2 %v1673_v20 }
  0x2e   :  { %394 = vmatpush.msrb.mxu0 %v1636_v13  ;;  %350 = vmatpush.msrb.mxu3 %v1678_v21 }
  0x2f   :  { %275 = vmatpush.msrb.mxu1 %v1636_v13  ;;  %312 = vmatpush.msrb.mxu2 %v1694_v24 }
  0x30   :  { %395 = vmatpush.msrb.mxu0 %v1655_v17  ;;  %351 = vmatpush.msrb.mxu3 %v1699_v25 }
  0x31   :  { %276 = vmatpush.msrb.mxu1 %v1655_v17  ;;  %91 = vmatmul.f32.gmra.mxu0 %v43_v6 }
  0x32   :  { %396 = vmatpush.msrb.mxu0 %v1686_v23  ;;  %313 = vmatpush.msrb.mxu2 %v1715_v28 }
  0x33   :  { %277 = vmatpush.msrb.mxu1 %v1686_v23  ;;  %352 = vmatpush.msrb.mxu3 %v1720_v29 }
  0x34   :  { %397 = vmatpush.msrb.mxu0 %v1707_v27  ;;  %314 = vmatpush.msrb.mxu2 %v1736_v32 }
  0x35   :  { %278 = vmatpush.msrb.mxu1 %v1707_v27  ;;  %353 = vmatpush.msrb.mxu3 %v1741_v33 }
  0x36   :  { %398 = vmatpush.msrb.mxu0 %v1728_v31  ;;  %315 = vmatpush.msrb.mxu2 %v1757_v36 }
  0x37   :  { %279 = vmatpush.msrb.mxu1 %v1728_v31  ;;  %354 = vmatpush.msrb.mxu3 %v1762_v37 }
  0x38   :  { %399 = vmatpush.msrb.mxu0 %v1749_v35  ;;  %316 = vmatpush.msrb.mxu2 %v1778_v40 }
  0x39   :  { %280 = vmatpush.msrb.mxu1 %v1749_v35  ;;  %94 = vmatmul.f32.gmra.mxu0 %v44_v8  ;;  %v777_v8 = vld [vmem:[%s2811_s5 + $0x40] sm:$0xff] }
  0x3a   :  { %400 = vmatpush.msrb.mxu0 %v1770_v39  ;;  %355 = vmatpush.msrb.mxu3 %v1783_v41 }
  0x3b   :  { %281 = vmatpush.msrb.mxu1 %v1770_v39  ;;  %317 = vmatpush.msrb.mxu2 %v1799_v44 }
  0x3c   :  { %401 = vmatpush.msrb.mxu0 %v1791_v43  ;;  %356 = vmatpush.msrb.mxu3 %v1804_v45 }
  0x3d   :  { %282 = vmatpush.msrb.mxu1 %v1791_v43  ;;  %318 = vmatpush.msrb.mxu2 %v1820_v48 }
  0x3e   :  { %402 = vmatpush.msrb.mxu0 %v1812_v47  ;;  %357 = vmatpush.msrb.mxu3 %v1825_v49 }
  0x3f   :  { %283 = vmatpush.msrb.mxu1 %v1812_v47  ;;  %319 = vmatpush.msrb.mxu2 %v1902_v54 }
  0x40   :  { %403 = vmatpush.msrb.mxu0 %v1833_v51  ;;  %358 = vmatpush.msrb.mxu3 %v1907_v55 }
  0x41   :  { %284 = vmatpush.msrb.mxu1 %v1833_v51  ;;  %97 = vmatmul.f32.gmra.mxu0 %v45_v12  ;;  %v2345_v12 = vld [vmem:[%s2812_s6 + $0x40] sm:$0xff] }
  0x42   :  { %547 = vmatpush.msra.mxu0 %v1645_v15  ;;  %320 = vmatpush.msrb.mxu2 %v1914_v56 }
  0x43   :  { %428 = vmatpush.msra.mxu1 %v1645_v15  ;;  %359 = vmatpush.msrb.mxu3 %v1919_v57 }
  0x44   :  { %548 = vmatpush.msra.mxu0 %v1662_v18  ;;  %321 = vmatpush.msrb.mxu2 %v1928_v58 }
  0x45   :  { %429 = vmatpush.msra.mxu1 %v1662_v18  ;;  %360 = vmatpush.msrb.mxu3 %v1933_v59 }
  0x46   :  { %549 = vmatpush.msra.mxu0 %v1673_v20  ;;  %322 = vmatpush.msrb.mxu2 %v1942_v60 }
  0x47   :  { %430 = vmatpush.msra.mxu1 %v1673_v20  ;;  %361 = vmatpush.msrb.mxu3 %v1947_v61 }
  0x48   :  { %550 = vmatpush.msra.mxu0 %v1694_v24  ;;  %323 = vmatpush.msrb.mxu2 %v1952_v62 }
  0x49   :  { %431 = vmatpush.msra.mxu1 %v1694_v24  ;;  %100 = vmatmul.f32.gmra.mxu0 %v46_v34  ;;  %v2365_v34 = vld [vmem:[%s2812_s6 + $0x30] sm:$0xff] }
  0x4a   :  { %551 = vmatpush.msra.mxu0 %v1715_v28  ;;  %362 = vmatpush.msrb.mxu3 %v1957_v63 }
  0x4b   :  { %432 = vmatpush.msra.mxu1 %v1715_v28  ;;  %324 = vmatpush.msrb.mxu2 %v1969_v1 }
  0x4c   :  { %552 = vmatpush.msra.mxu0 %v1736_v32  ;;  %363 = vmatpush.msrb.mxu3 %v1974_v4 }
  0x4d   :  { %433 = vmatpush.msra.mxu1 %v1736_v32 }
  0x4e   :  { %553 = vmatpush.msra.mxu0 %v1757_v36 }
  0x4f   :  { %434 = vmatpush.msra.mxu1 %v1757_v36 }
  0x50   :  { %554 = vmatpush.msra.mxu0 %v1778_v40 }
  0x51   :  { %435 = vmatpush.msra.mxu1 %v1778_v40  ;;  %103 = vmatmul.f32.gmra.mxu0 %v47_v42  ;;  %v2374_v42 = vld [vmem:[%s2812_s6 + $0x28] sm:$0xff] }
  0x52   :  { %555 = vmatpush.msra.mxu0 %v1799_v44 }
  0x53   :  { %436 = vmatpush.msra.mxu1 %v1799_v44 }
  0x54   :  { %556 = vmatpush.msra.mxu0 %v1820_v48 }
  0x55   :  { %437 = vmatpush.msra.mxu1 %v1820_v48 }
  0x56   :  { %557 = vmatpush.msra.mxu0 %v1902_v54 }
  0x57   :  { %438 = vmatpush.msra.mxu1 %v1902_v54 }
  0x58   :  { %558 = vmatpush.msra.mxu0 %v1914_v56 }
  0x59   :  { %439 = vmatpush.msra.mxu1 %v1914_v56  ;;  %106 = vmatmul.f32.gmra.mxu0 %v48_v46 }
  0x5a   :  { %559 = vmatpush.msra.mxu0 %v1928_v58 }
  0x5b   :  { %440 = vmatpush.msra.mxu1 %v1928_v58 }
  0x5c   :  { %560 = vmatpush.msra.mxu0 %v1942_v60 }
  0x5d   :  { %441 = vmatpush.msra.mxu1 %v1942_v60 }
  0x5e   :  { %561 = vmatpush.msra.mxu0 %v1952_v62 }
  0x5f   :  { %442 = vmatpush.msra.mxu1 %v1952_v62 }
  0x60   :  { %562 = vmatpush.msra.mxu0 %v1969_v1 }
  0x61   :  { %443 = vmatpush.msra.mxu1 %v1969_v1 }
  0x9e   :  { %v86_v14 = vpop.f32.mrf.mxu0 }
  0x9f   :  { %v167_v22 = vpop.f32.mrf.mxu1  ;;  %v87_v26 = vadd.f32 %v2012_v10, %v86_v14 }
  0xa1   :  { %v170_v30 = vadd.f32 %v167_v22, %v87_v26  ;;  %v776_v22 = vld [vmem:[%s2811_s5 + $0x38] sm:$0xff] }
  0xa2   :  { %v2356_v26 = vld [vmem:[%s2812_s6 + $0x38] sm:$0xff] }
  0xa3   :  { %1480 = vtanh.f32 %v170_v30  ;;  %v775_v30 = vld [vmem:[%s2811_s5 + $0x30] sm:$0xff] }
  0xa6   :  { %v89_v50 = vpop.f32.mrf.mxu0 }
  0xa7   :  { %v90_v52 = vadd.f32 %v2012_v10, %v89_v50 }
  0xa9   :  { %v1481_v38 = vpop.eup %1480 }
  0xaa   :  { %206 = vmatmul.f32.vlgmr.msra.gmra.mxu2 %v1481_v38  ;;  %245 = vmatmul.f32.vlgmr.msra.gmra.mxu3 %v1481_v38 }
  0xab   :  { %285 = vmatmul.f32.vlgmr.msrb.gmra.mxu1 %v1481_v38  ;;  %467 = vmatpush.msra.mxu2 %v1650_v16  ;;  %v774_v38 = vld [vmem:[%s2811_s5 + $0x28] sm:$0xff] }
  0xac   :  { %507 = vmatpush.msra.mxu3 %v1586_v2  ;;  %586 = vmatpush.msrb.mxu1 %v1650_v16 }
  0xad   :  { %468 = vmatpush.msra.mxu2 %v1667_v19 }
  0xae   :  { %508 = vmatpush.msra.mxu3 %v1592_v3  ;;  %587 = vmatpush.msrb.mxu1 %v1667_v19 }
  0xaf   :  { %469 = vmatpush.msra.mxu2 %v1678_v21 }
  0xb0   :  { %509 = vmatpush.msra.mxu3 %v1600_v5  ;;  %588 = vmatpush.msrb.mxu1 %v1678_v21 }
  0xb1   :  { %470 = vmatpush.msra.mxu2 %v1699_v25 }
  0xb2   :  { %510 = vmatpush.msra.mxu3 %v1609_v7  ;;  %589 = vmatpush.msrb.mxu1 %v1699_v25 }
  0xb3   :  { %471 = vmatpush.msra.mxu2 %v1720_v29 }
  0xb4   :  { %511 = vmatpush.msra.mxu3 %v1618_v9  ;;  %590 = vmatpush.msrb.mxu1 %v1720_v29 }
  0xb5   :  { %472 = vmatpush.msra.mxu2 %v1741_v33 }
  0xb6   :  { %512 = vmatpush.msra.mxu3 %v1627_v11  ;;  %591 = vmatpush.msrb.mxu1 %v1741_v33 }
  0xb7   :  { %473 = vmatpush.msra.mxu2 %v1762_v37 }
  0xb8   :  { %513 = vmatpush.msra.mxu3 %v1636_v13  ;;  %592 = vmatpush.msrb.mxu1 %v1762_v37 }
  0xb9   :  { %474 = vmatpush.msra.mxu2 %v1783_v41 }
  0xba   :  { %514 = vmatpush.msra.mxu3 %v1655_v17  ;;  %593 = vmatpush.msrb.mxu1 %v1783_v41 }
  0xbb   :  { %475 = vmatpush.msra.mxu2 %v1804_v45 }
  0xbc   :  { %515 = vmatpush.msra.mxu3 %v1686_v23  ;;  %594 = vmatpush.msrb.mxu1 %v1804_v45 }
  0xbd   :  { %476 = vmatpush.msra.mxu2 %v1825_v49 }
  0xbe   :  { %516 = vmatpush.msra.mxu3 %v1707_v27  ;;  %595 = vmatpush.msrb.mxu1 %v1825_v49 }
  0xbf   :  { %477 = vmatpush.msra.mxu2 %v1907_v55 }
  0xc0   :  { %517 = vmatpush.msra.mxu3 %v1728_v31  ;;  %596 = vmatpush.msrb.mxu1 %v1907_v55 }
  0xc1   :  { %478 = vmatpush.msra.mxu2 %v1919_v57 }
  0xc2   :  { %518 = vmatpush.msra.mxu3 %v1749_v35  ;;  %597 = vmatpush.msrb.mxu1 %v1919_v57 }
  0xc3   :  { %479 = vmatpush.msra.mxu2 %v1933_v59 }
  0xc4   :  { %519 = vmatpush.msra.mxu3 %v1770_v39  ;;  %598 = vmatpush.msrb.mxu1 %v1933_v59 }
  0xc5   :  { %480 = vmatpush.msra.mxu2 %v1947_v61 }
  0xc6   :  { %520 = vmatpush.msra.mxu3 %v1791_v43  ;;  %599 = vmatpush.msrb.mxu1 %v1947_v61 }
  0xc7   :  { %481 = vmatpush.msra.mxu2 %v1957_v63 }
  0xc8   :  { %521 = vmatpush.msra.mxu3 %v1812_v47  ;;  %600 = vmatpush.msrb.mxu1 %v1957_v63 }
  0xc9   :  { %482 = vmatpush.msra.mxu2 %v1974_v4 }
  0xca   :  { %522 = vmatpush.msra.mxu3 %v1833_v51  ;;  %601 = vmatpush.msrb.mxu1 %v1974_v4 }
 0x128   :  { %v286_v53 = vpop.f32.mrf.mxu1 }
 0x129   :  { %v289_v0 = vadd.f32 %v286_v53, %v90_v52 }
 0x12b   :  { %1482 = vtanh.f32 %v289_v0  ;;  %v773_v0 = vld [vmem:[%s2811_s5 + $0x20] sm:$0xff] }
 0x131   :  { %v1483_v6 = vpop.eup %1482 }
 0x132   :  { %325 = vmatmul.f32.vlgmr.msrb.gmra.mxu2 %v1483_v6  ;;  %364 = vmatmul.f32.vlgmr.msrb.gmra.mxu3 %v1483_v6 }
 0x133   :  { %404 = vmatmul.f32.vlgmr.msrb.gmra.mxu0 %v1483_v6  ;;  %626 = vmatpush.msrb.mxu2 %v1586_v2  ;;  %v92_v2 = vpop.f32.mrf.mxu0  ;;  %v2388_v6 = vld [vmem:[%s2812_s6 + $0x20] sm:$0xff] }
 0x134   :  { %666 = vmatpush.msrb.mxu3 %v1645_v15  ;;  %705 = vmatpush.msrb.mxu0 %v1650_v16 }
 0x135   :  { %627 = vmatpush.msrb.mxu2 %v1592_v3 }
 0x136   :  { %667 = vmatpush.msrb.mxu3 %v1662_v18  ;;  %706 = vmatpush.msrb.mxu0 %v1667_v19  ;;  %v2151_v18 = vld [vmem:[%s2810_s2 + $0x78] sm:$0xff]  ;;  %v2156_v19 = vld [vmem:[%s2810_s2 + $0x70] sm:$0xff] }
 0x137   :  { %628 = vmatpush.msrb.mxu2 %v1600_v5 }
 0x138   :  { %668 = vmatpush.msrb.mxu3 %v1673_v20  ;;  %707 = vmatpush.msrb.mxu0 %v1678_v21  ;;  %v2162_v20 = vld [vmem:[%s2810_s2 + $0x68] sm:$0xff]  ;;  %v2168_v21 = vld [vmem:[%s2810_s2 + $0x60] sm:$0xff] }
 0x139   :  { %629 = vmatpush.msrb.mxu2 %v1609_v7 }
 0x13a   :  { %669 = vmatpush.msrb.mxu3 %v1694_v24  ;;  %708 = vmatpush.msrb.mxu0 %v1699_v25  ;;  %v2176_v24 = vld [vmem:[%s2810_s2 + $0x58] sm:$0xff]  ;;  %v2182_v25 = vld [vmem:[%s2810_s2 + $0x50] sm:$0xff] }
 0x13b   :  { %630 = vmatpush.msrb.mxu2 %v1618_v9  ;;  %v95_v3 = vpop.f32.mrf.mxu0 }
 0x13c   :  { %670 = vmatpush.msrb.mxu3 %v1715_v28  ;;  %709 = vmatpush.msrb.mxu0 %v1720_v29  ;;  %v2194_v28 = vld [vmem:[%s2810_s2 + $0x40] sm:$0xff] }
 0x13d   :  { %631 = vmatpush.msrb.mxu2 %v1627_v11 }
 0x13e   :  { %671 = vmatpush.msrb.mxu3 %v1736_v32  ;;  %710 = vmatpush.msrb.mxu0 %v1741_v33 }
 0x13f   :  { %632 = vmatpush.msrb.mxu2 %v1636_v13  ;;  %v93_v13 = vadd.f32 %v2012_v10, %v92_v2  ;;  %v772_v2 = vld [vmem:[%s2811_s5 + $0x18] sm:$0xff] }
 0x140   :  { %672 = vmatpush.msrb.mxu3 %v1757_v36  ;;  %711 = vmatpush.msrb.mxu0 %v1762_v37  ;;  %v2212_v36 = vld [vmem:[%s2810_s2 + $0x38] sm:$0xff]  ;;  %v2217_v37 = vld [vmem:[%s2810_s2 + $0x30] sm:$0xff] }
 0x141   :  { %633 = vmatpush.msrb.mxu2 %v1655_v17 }
 0x142   :  { %673 = vmatpush.msrb.mxu3 %v1778_v40  ;;  %712 = vmatpush.msrb.mxu0 %v1783_v41  ;;  %v2233_v40 = vld [vmem:[%s2810_s2 + $0x20] sm:$0xff]  ;;  %v2240_v41 = vld [vmem:[%s2810_s2 + $0x18] sm:$0xff] }
 0x143   :  { %634 = vmatpush.msrb.mxu2 %v1686_v23  ;;  %v2139_v5 = vpop.f32.mrf.mxu0  ;;  %v2170_v23 = vpop.f32.mrf.mxu3 }
 0x144   :  { %674 = vmatpush.msrb.mxu3 %v1799_v44  ;;  %713 = vmatpush.msrb.mxu0 %v1804_v45  ;;  %v2252_v44 = vld [vmem:[%s2810_s2 + $0x8] sm:$0xff]  ;;  %v2259_v45 = vld [vmem:[%s2810_s2] sm:$0xff]  ;;  %v99_v46 = vadd.f32 %v2012_v10, %v2139_v5  ;;  %v771_v5 = vld [vmem:[%s2811_s5 + $0x10] sm:$0xff] }
 0x145   :  { %635 = vmatpush.msrb.mxu2 %v1707_v27  ;;  %v2188_v27 = vld [vmem:[%s2810_s2 + $0x48] sm:$0xff] }
 0x146   :  { %675 = vmatpush.msrb.mxu3 %v1820_v48  ;;  %714 = vmatpush.msrb.mxu0 %v1825_v49  ;;  %v2270_v48 = vld [vmem:[%s2811_s5 + $0x78] sm:$0xff] }
 0x147   :  { %636 = vmatpush.msrb.mxu2 %v1728_v31  ;;  %v96_v31 = vadd.f32 %v2012_v10, %v95_v3  ;;  %v2275_v49 = vld [vmem:[%s2812_s6 + $0x78] sm:$0xff] }
 0x148   :  { %676 = vmatpush.msrb.mxu3 %v1902_v54  ;;  %715 = vmatpush.msrb.mxu0 %v1907_v55  ;;  %v2287_v54 = vld [vmem:[%s2812_s6 + $0x70] sm:$0xff]  ;;  %v782_v55 = vld [vmem:[%s2811_s5 + $0x68] sm:$0xff]  ;;  %v2397_v3 = vld [vmem:[%s2812_s6 + $0x18] sm:$0xff] }
 0x149   :  { %637 = vmatpush.msrb.mxu2 %v1749_v35 }
 0x14a   :  { %677 = vmatpush.msrb.mxu3 %v1914_v56  ;;  %716 = vmatpush.msrb.mxu0 %v1919_v57  ;;  %v2295_v56 = vld [vmem:[%s2812_s6 + $0x68] sm:$0xff]  ;;  %v781_v57 = vld [vmem:[%s2811_s5 + $0x60] sm:$0xff] }
 0x14b   :  { %638 = vmatpush.msrb.mxu2 %v1770_v39  ;;  %v2141_v7 = vpop.f32.mrf.mxu0  ;;  %v2224_v39 = vld [vmem:[%s2810_s2 + $0x28] sm:$0xff] }
 0x14c   :  { %678 = vmatpush.msrb.mxu3 %v1928_v58  ;;  %717 = vmatpush.msrb.mxu0 %v1933_v59  ;;  %v2306_v58 = vld [vmem:[%s2812_s6 + $0x60] sm:$0xff] }
 0x14d   :  { %639 = vmatpush.msrb.mxu2 %v1791_v43  ;;  %v2246_v43 = vld [vmem:[%s2810_s2 + $0x10] sm:$0xff] }
 0x14e   :  { %679 = vmatpush.msrb.mxu3 %v1942_v60  ;;  %718 = vmatpush.msrb.mxu0 %v1947_v61  ;;  %v780_v60 = vld [vmem:[%s2811_s5 + $0x58] sm:$0xff] }
 0x14f   :  { %640 = vmatpush.msrb.mxu2 %v1812_v47  ;;  %v2263_v47 = vpop.f32.mrf.mxu2  ;;  %v2318_v61 = vld [vmem:[%s2812_s6 + $0x58] sm:$0xff] }
 0x150   :  { %680 = vmatpush.msrb.mxu3 %v1952_v62  ;;  %719 = vmatpush.msrb.mxu0 %v1957_v63  ;;  %v779_v62 = vld [vmem:[%s2811_s5 + $0x50] sm:$0xff] }
 0x151   :  { %641 = vmatpush.msrb.mxu2 %v1833_v51  ;;  %v2280_v51 = vld [vmem:[%s2811_s5 + $0x70] sm:$0xff] }
 0x152   :  { %681 = vmatpush.msrb.mxu3 %v1969_v1  ;;  %720 = vmatpush.msrb.mxu0 %v1974_v4  ;;  %v2327_v63 = vld [vmem:[%s2812_s6 + $0x50] sm:$0xff]  ;;  %v778_v1 = vld [vmem:[%s2811_s5 + $0x48] sm:$0xff] }
 0x153   :  { %v2143_v9 = vpop.f32.mrf.mxu0  ;;  %v2336_v4 = vld [vmem:[%s2812_s6 + $0x48] sm:$0xff] }
 0x15b   :  { %v2145_v11 = vpop.f32.mrf.mxu0 }
 0x1b0   :  { %v405_v15 = vpop.f32.mrf.mxu0 }
 0x1b1   :  { %v408_v16 = vadd.f32 %v405_v15, %v93_v13  ;;  %v2406_v13 = vld [vmem:[%s2812_s6 + $0x10] sm:$0xff]  ;;  %v770_v15 = vld [vmem:[%s2811_s5 + $0x8] sm:$0xff] }
 0x1b3   :  { %1484 = vtanh.f32 %v408_v16  ;;  %v2415_v16 = vld [vmem:[%s2812_s6 + $0x8] sm:$0xff] }
 0x1b5   :  { %v2196_v29 = vpop.f32.mrf.mxu3  ;;  %v2309_v59 = vpop.f32.mrf.mxu2 }
 0x1b9   :  { %v1485_v17 = vpop.eup %1484 }
 0x1ba   :  { %444 = vmatmul.f32.vlgmr.msra.gmra.mxu1 %v1485_v17  ;;  %483 = vmatmul.f32.vlgmr.msra.gmra.mxu2 %v1485_v17 }
 0x1bb   :  { %523 = vmatmul.f32.vlgmr.msra.gmra.mxu3 %v1485_v17  ;;  %745 = vmatpush.msra.mxu1 %v2151_v18  ;;  %v769_v17 = vld [vmem:[%s2811_s5] sm:$0xff] }
 0x1bc   :  { %785 = vmatpush.msra.mxu2 %v2270_v48  ;;  %824 = vmatpush.msra.mxu3 %v2275_v49 }
 0x1bd   :  { %746 = vmatpush.msra.mxu1 %v2156_v19 }
 0x1be   :  { %786 = vmatpush.msra.mxu2 %v2280_v51  ;;  %825 = vmatpush.msra.mxu3 %v2287_v54 }
 0x1bf   :  { %747 = vmatpush.msra.mxu1 %v2162_v20 }
 0x1c0   :  { %787 = vmatpush.msra.mxu2 %v782_v55  ;;  %826 = vmatpush.msra.mxu3 %v2295_v56 }
 0x1c1   :  { %748 = vmatpush.msra.mxu1 %v2168_v21 }
 0x1c2   :  { %788 = vmatpush.msra.mxu2 %v781_v57  ;;  %827 = vmatpush.msra.mxu3 %v2306_v58 }
 0x1c3   :  { %749 = vmatpush.msra.mxu1 %v2176_v24 }
 0x1c4   :  { %789 = vmatpush.msra.mxu2 %v780_v60  ;;  %828 = vmatpush.msra.mxu3 %v2318_v61 }
 0x1c5   :  { %750 = vmatpush.msra.mxu1 %v2182_v25 }
 0x1c6   :  { %790 = vmatpush.msra.mxu2 %v779_v62  ;;  %829 = vmatpush.msra.mxu3 %v2327_v63 }
 0x1c7   :  { %751 = vmatpush.msra.mxu1 %v2188_v27 }
 0x1c8   :  { %791 = vmatpush.msra.mxu2 %v778_v1  ;;  %830 = vmatpush.msra.mxu3 %v2336_v4 }
 0x1c9   :  { %752 = vmatpush.msra.mxu1 %v2194_v28 }
 0x1ca   :  { %792 = vmatpush.msra.mxu2 %v777_v8  ;;  %831 = vmatpush.msra.mxu3 %v2345_v12 }
 0x1cb   :  { %753 = vmatpush.msra.mxu1 %v2212_v36 }
 0x1cc   :  { %793 = vmatpush.msra.mxu2 %v776_v22  ;;  %832 = vmatpush.msra.mxu3 %v2356_v26 }
 0x1cd   :  { %754 = vmatpush.msra.mxu1 %v2217_v37 }
 0x1ce   :  { %794 = vmatpush.msra.mxu2 %v775_v30  ;;  %833 = vmatpush.msra.mxu3 %v2365_v34 }
 0x1cf   :  { %755 = vmatpush.msra.mxu1 %v2224_v39 }
 0x1d0   :  { %795 = vmatpush.msra.mxu2 %v774_v38  ;;  %834 = vmatpush.msra.mxu3 %v2374_v42 }
 0x1d1   :  { %756 = vmatpush.msra.mxu1 %v2233_v40 }
 0x1d2   :  { %796 = vmatpush.msra.mxu2 %v773_v0  ;;  %835 = vmatpush.msra.mxu3 %v2388_v6 }
 0x1d3   :  { %757 = vmatpush.msra.mxu1 %v2240_v41 }
 0x1d4   :  { %797 = vmatpush.msra.mxu2 %v772_v2  ;;  %836 = vmatpush.msra.mxu3 %v2397_v3 }
 0x1d5   :  { %758 = vmatpush.msra.mxu1 %v2246_v43 }
 0x1d6   :  { %798 = vmatpush.msra.mxu2 %v771_v5  ;;  %837 = vmatpush.msra.mxu3 %v2406_v13 }
 0x1d7   :  { %759 = vmatpush.msra.mxu1 %v2252_v44 }
 0x1d8   :  { %799 = vmatpush.msra.mxu2 %v770_v15  ;;  %838 = vmatpush.msra.mxu3 %v2415_v16 }
 0x1d9   :  { %760 = vmatpush.msra.mxu1 %v2259_v45 }
 0x1da   :  { %800 = vmatpush.msra.mxu2 %v769_v17 }
 0x23d   :  { %v2347_v14 = vpop.f32.mrf.mxu2 }
 0x23e   :  { %v524_v32 = vpop.f32.mrf.mxu3 }
 0x23f   :  { %v527_v33 = vadd.f32 %v524_v32, %v96_v31  ;;  %v2424_v31 = vld [vmem:[%s2812_s6] sm:$0xff]  ;;  %v2435_v32 = vpop.f32.mrf.mxu1 }
 0x240   :  { %839 = vmatpush.msra.mxu3 %v2424_v31 }
 0x241   :  { %1486 = vtanh.f32 %v527_v33 }
 0x247   :  { %v1487_v35 = vpop.eup %1486 }
 0x248   :  { %563 = vmatmul.f32.vlgmr.msra.gmra.mxu0 %v1487_v35  ;;  %602 = vmatmul.f32.vlgmr.msrb.gmra.mxu1 %v1487_v35 }
 0x249   :  { %642 = vmatmul.f32.vlgmr.msrb.gmra.mxu2 %v1487_v35  ;;  %864 = vmatpush.msra.mxu0 %v2151_v18  ;;  %v2514_v35 = vld [vmem:[%s2817_s7 + $0x58] sm:$0xff] }
 0x24a   :  { %904 = vmatpush.msrb.mxu1 %v2270_v48  ;;  %943 = vmatpush.msrb.mxu2 %v2275_v49 }
 0x24b   :  { %865 = vmatpush.msra.mxu0 %v2156_v19 }
 0x24c   :  { %905 = vmatpush.msrb.mxu1 %v2280_v51  ;;  %944 = vmatpush.msrb.mxu2 %v2287_v54 }
 0x24d   :  { %866 = vmatpush.msra.mxu0 %v2162_v20 }
 0x24e   :  { %906 = vmatpush.msrb.mxu1 %v782_v55  ;;  %945 = vmatpush.msrb.mxu2 %v2295_v56 }
 0x24f   :  { %867 = vmatpush.msra.mxu0 %v2168_v21 }
 0x250   :  { %907 = vmatpush.msrb.mxu1 %v781_v57  ;;  %946 = vmatpush.msrb.mxu2 %v2306_v58 }
 0x251   :  { %868 = vmatpush.msra.mxu0 %v2176_v24 }
 0x252   :  { %908 = vmatpush.msrb.mxu1 %v780_v60  ;;  %947 = vmatpush.msrb.mxu2 %v2318_v61 }
 0x253   :  { %869 = vmatpush.msra.mxu0 %v2182_v25 }
 0x254   :  { %909 = vmatpush.msrb.mxu1 %v779_v62  ;;  %948 = vmatpush.msrb.mxu2 %v2327_v63 }
 0x255   :  { %870 = vmatpush.msra.mxu0 %v2188_v27 }
 0x256   :  { %910 = vmatpush.msrb.mxu1 %v778_v1  ;;  %949 = vmatpush.msrb.mxu2 %v2336_v4 }
 0x257   :  { %871 = vmatpush.msra.mxu0 %v2194_v28 }
 0x258   :  { %911 = vmatpush.msrb.mxu1 %v777_v8  ;;  %950 = vmatpush.msrb.mxu2 %v2345_v12 }
 0x259   :  { %872 = vmatpush.msra.mxu0 %v2212_v36 }
 0x25a   :  { %912 = vmatpush.msrb.mxu1 %v776_v22  ;;  %951 = vmatpush.msrb.mxu2 %v2356_v26 }
 0x25b   :  { %873 = vmatpush.msra.mxu0 %v2217_v37 }
 0x25c   :  { %913 = vmatpush.msrb.mxu1 %v775_v30  ;;  %952 = vmatpush.msrb.mxu2 %v2365_v34 }
 0x25d   :  { %874 = vmatpush.msra.mxu0 %v2224_v39 }
 0x25e   :  { %914 = vmatpush.msrb.mxu1 %v774_v38  ;;  %953 = vmatpush.msrb.mxu2 %v2374_v42 }
 0x25f   :  { %875 = vmatpush.msra.mxu0 %v2233_v40 }
 0x260   :  { %915 = vmatpush.msrb.mxu1 %v773_v0  ;;  %954 = vmatpush.msrb.mxu2 %v2388_v6 }
 0x261   :  { %876 = vmatpush.msra.mxu0 %v2240_v41 }
 0x262   :  { %916 = vmatpush.msrb.mxu1 %v772_v2  ;;  %955 = vmatpush.msrb.mxu2 %v2397_v3 }
 0x263   :  { %877 = vmatpush.msra.mxu0 %v2246_v43 }
 0x264   :  { %917 = vmatpush.msrb.mxu1 %v771_v5  ;;  %956 = vmatpush.msrb.mxu2 %v2406_v13 }
 0x265   :  { %878 = vmatpush.msra.mxu0 %v2252_v44 }
 0x266   :  { %918 = vmatpush.msrb.mxu1 %v770_v15  ;;  %957 = vmatpush.msrb.mxu2 %v2415_v16 }
 0x267   :  { %879 = vmatpush.msra.mxu0 %v2259_v45 }
 0x268   :  { %919 = vmatpush.msrb.mxu1 %v769_v17  ;;  %958 = vmatpush.msrb.mxu2 %v2424_v31 }
 0x2c5   :  { %v2507_v33 = vpop.f32.mrf.mxu0 }
 0x2cc   :  { %v643_v50 = vpop.f32.mrf.mxu2 }
 0x2cd   :  { %v646_v52 = vadd.f32 %v643_v50, %v99_v46 }
 0x2cf   :  { %1488 = vtanh.f32 %v646_v52 }
 0x2d5   :  { %v1489_v53 = vpop.eup %1488 }
 0x2d6   :  { %682 = vmatmul.f32.vlgmr.msrb.gmra.mxu3 %v1489_v53  ;;  %721 = vmatmul.f32.vlgmr.msrb.gmra.mxu0 %v1489_v53 }
 0x2d7   :  { %761 = vmatmul.f32.vlgmr.msra.gmra.mxu1 %v1489_v53  ;;  %1023 = vmatpush.msrb.mxu0 %v2270_v48 }
 0x2d8   :  { %983 = vmatpush.msrb.mxu3 %v2151_v18  ;;  %1062 = vmatpush.msra.mxu1 %v2275_v49  ;;  %v2449_v18 = vpop.f32.mrf.mxu1 }
 0x2d9   :  { %1024 = vmatpush.msrb.mxu0 %v2280_v51  ;;  %v2585_v51 = vld [vmem:[%s2817_s7 + $0x20] sm:$0xff] }
 0x2da   :  { %984 = vmatpush.msrb.mxu3 %v2156_v19  ;;  %1063 = vmatpush.msra.mxu1 %v2287_v54  ;;  %v102_v19 = vadd.f32 %v2012_v10, %v2141_v7  ;;  %v2592_v54 = vld [vmem:[%s2817_s7 + $0x18] sm:$0xff] }
 0x2db   :  { %1025 = vmatpush.msrb.mxu0 %v782_v55  ;;  %v2605_v55 = vld [vmem:[%s2817_s7 + $0x10] sm:$0xff] }
 0x2dc   :  { %985 = vmatpush.msrb.mxu3 %v2162_v20  ;;  %1064 = vmatpush.msra.mxu1 %v2295_v56  ;;  %v2614_v56 = vld [vmem:[%s2817_s7 + $0x8] sm:$0xff] }
 0x2dd   :  { %1026 = vmatpush.msrb.mxu0 %v781_v57  ;;  %v2623_v57 = vld [vmem:[%s2817_s7] sm:$0xff] }
 0x2de   :  { %986 = vmatpush.msrb.mxu3 %v2168_v21  ;;  %1065 = vmatpush.msra.mxu1 %v2306_v58  ;;  %v1086_v58 = vld [vmem:[%s2818_s9] sm:$0xff] }
 0x2df   :  { %1027 = vmatpush.msrb.mxu0 %v780_v60 }
 0x2e0   :  { %987 = vmatpush.msrb.mxu3 %v2176_v24  ;;  %1066 = vmatpush.msra.mxu1 %v2318_v61  ;;  %v2484_v24 = vld [vmem:[%s2817_s7 + $0x78] sm:$0xff] }
 0x2e1   :  { %1028 = vmatpush.msrb.mxu0 %v779_v62  ;;  %v108_v62 = vadd.f32 %v2012_v10, %v2145_v11 }
 0x2e2   :  { %988 = vmatpush.msrb.mxu3 %v2182_v25  ;;  %1067 = vmatpush.msra.mxu1 %v2327_v63  ;;  %v2489_v25 = vld [vmem:[%s2817_s7 + $0x70] sm:$0xff] }
 0x2e3   :  { %1029 = vmatpush.msrb.mxu0 %v778_v1 }
 0x2e4   :  { %989 = vmatpush.msrb.mxu3 %v2188_v27  ;;  %1068 = vmatpush.msra.mxu1 %v2336_v4  ;;  %v2496_v27 = vld [vmem:[%s2817_s7 + $0x68] sm:$0xff] }
 0x2e5   :  { %1030 = vmatpush.msrb.mxu0 %v777_v8 }
 0x2e6   :  { %990 = vmatpush.msrb.mxu3 %v2194_v28  ;;  %1069 = vmatpush.msra.mxu1 %v2345_v12  ;;  %v2504_v28 = vld [vmem:[%s2817_s7 + $0x60] sm:$0xff] }
 0x2e7   :  { %1031 = vmatpush.msrb.mxu0 %v776_v22  ;;  %v2712_v12 = vld [vmem:[%s2816_s8] ss:$0 sm:$0xff] }
 0x2e8   :  { %991 = vmatpush.msrb.mxu3 %v2212_v36  ;;  %1070 = vmatpush.msra.mxu1 %v2356_v26  ;;  %v2522_v36 = vld [vmem:[%s2817_s7 + $0x50] sm:$0xff]  ;;  %v210_v22 = vadd.f32 %v2712_v12, %v2263_v47  ;;  %v329_v46 = vadd.f32 %v2712_v12, %v2309_v59  ;;  %v448_v47 = vadd.f32 %v2712_v12, %v2435_v32 }
 0x2e9   :  { %1032 = vmatpush.msrb.mxu0 %v775_v30  ;;  %v567_v59 = vadd.f32 %v2712_v12, %v2507_v33  ;;  %v606_v32 = vadd.f32 %v2712_v12, %v2449_v18 }
 0x2ea   :  { %992 = vmatpush.msrb.mxu3 %v2217_v37  ;;  %1071 = vmatpush.msra.mxu1 %v2365_v34  ;;  %v2530_v37 = vld [vmem:[%s2817_s7 + $0x48] sm:$0xff] }
 0x2eb   :  { %1033 = vmatpush.msrb.mxu0 %v774_v38 }
 0x2ec   :  { %993 = vmatpush.msrb.mxu3 %v2224_v39  ;;  %1072 = vmatpush.msra.mxu1 %v2374_v42  ;;  %v2538_v39 = vld [vmem:[%s2817_s7 + $0x40] sm:$0xff] }
 0x2ed   :  { %1034 = vmatpush.msrb.mxu0 %v773_v0 }
 0x2ee   :  { %994 = vmatpush.msrb.mxu3 %v2233_v40  ;;  %1073 = vmatpush.msra.mxu1 %v2388_v6 }
 0x2ef   :  { %1035 = vmatpush.msrb.mxu0 %v772_v2 }
 0x2f0   :  { %995 = vmatpush.msrb.mxu3 %v2240_v41  ;;  %1074 = vmatpush.msra.mxu1 %v2397_v3  ;;  %v2548_v41 = vld [vmem:[%s2817_s7 + $0x38] sm:$0xff] }
 0x2f1   :  { %1036 = vmatpush.msrb.mxu0 %v771_v5 }
 0x2f2   :  { %996 = vmatpush.msrb.mxu3 %v2246_v43  ;;  %1075 = vmatpush.msra.mxu1 %v2406_v13  ;;  %v2556_v43 = vld [vmem:[%s2817_s7 + $0x30] sm:$0xff] }
 0x2f3   :  { %1037 = vmatpush.msrb.mxu0 %v770_v15 }
 0x2f4   :  { %997 = vmatpush.msrb.mxu3 %v2252_v44  ;;  %1076 = vmatpush.msra.mxu1 %v2415_v16  ;;  %v105_v44 = vadd.f32 %v2012_v10, %v2143_v9  ;;  %v2580_v9 = vld [vmem:[%s2817_s7 + $0x28] sm:$0xff] }
 0x2f5   :  { %1038 = vmatpush.msrb.mxu0 %v769_v17 }
 0x2f6   :  { %998 = vmatpush.msrb.mxu3 %v2259_v45  ;;  %1077 = vmatpush.msra.mxu1 %v2424_v31 }
 0x353   :  { %v2541_v40 = vpop.f32.mrf.mxu0 }
 0x354   :  { %v762_v20 = vpop.f32.mrf.mxu1  ;;  %v725_v15 = vadd.f32 %v2541_v40, %v567_v59 }
 0x355   :  { %v765_v21 = vadd.f32 %v762_v20, %v102_v19  ;;  %v38_v20 = vlaneseq }
 0x357   :  { %1490 = vtanh.f32 %v765_v21 }
 0x359   :  { %v2643_v60 = vpop.f32.mrf.mxu3 }
 0x35a   :  { %v686_v19 = vadd.f32 %v2643_v60, %v606_v32 }
 0x35d   :  { %v1491_v7 = vpop.eup %1490 }
 0x35e   :  { %801 = vmatmul.f32.vlgmr.msra.gmra.mxu2 %v1491_v7  ;;  %840 = vmatmul.f32.vlgmr.msra.gmra.mxu3 %v1491_v7 }
 0x35f   :  { %880 = vmatmul.f32.vlgmr.msra.gmra.mxu0 %v1491_v7  ;;  %1106 = vmatpush.msra.mxu2 %v2484_v24 }
 0x360   :  { %1153 = vmatpush.msra.mxu3 %v2484_v24  ;;  %1200 = vmatpush.msra.mxu0 %v2484_v24 }
 0x361   :  { %1107 = vmatpush.msra.mxu2 %v2489_v25 }
 0x362   :  { %1154 = vmatpush.msra.mxu3 %v2489_v25  ;;  %1201 = vmatpush.msra.mxu0 %v2489_v25 }
 0x363   :  { %1108 = vmatpush.msra.mxu2 %v2496_v27 }
 0x364   :  { %1155 = vmatpush.msra.mxu3 %v2496_v27  ;;  %1202 = vmatpush.msra.mxu0 %v2496_v27 }
 0x365   :  { %1109 = vmatpush.msra.mxu2 %v2504_v28 }
 0x366   :  { %1156 = vmatpush.msra.mxu3 %v2504_v28  ;;  %1203 = vmatpush.msra.mxu0 %v2504_v28 }
 0x367   :  { %1110 = vmatpush.msra.mxu2 %v2514_v35 }
 0x368   :  { %1157 = vmatpush.msra.mxu3 %v2514_v35  ;;  %1204 = vmatpush.msra.mxu0 %v2514_v35 }
 0x369   :  { %1111 = vmatpush.msra.mxu2 %v2522_v36 }
 0x36a   :  { %1158 = vmatpush.msra.mxu3 %v2522_v36  ;;  %1205 = vmatpush.msra.mxu0 %v2522_v36 }
 0x36b   :  { %1112 = vmatpush.msra.mxu2 %v2530_v37 }
 0x36c   :  { %1159 = vmatpush.msra.mxu3 %v2530_v37  ;;  %1206 = vmatpush.msra.mxu0 %v2530_v37 }
 0x36d   :  { %1113 = vmatpush.msra.mxu2 %v2538_v39 }
 0x36e   :  { %1160 = vmatpush.msra.mxu3 %v2538_v39  ;;  %1207 = vmatpush.msra.mxu0 %v2538_v39 }
 0x36f   :  { %1114 = vmatpush.msra.mxu2 %v2548_v41 }
 0x370   :  { %1161 = vmatpush.msra.mxu3 %v2548_v41  ;;  %1208 = vmatpush.msra.mxu0 %v2548_v41 }
 0x371   :  { %1115 = vmatpush.msra.mxu2 %v2556_v43 }
 0x372   :  { %1162 = vmatpush.msra.mxu3 %v2556_v43  ;;  %1209 = vmatpush.msra.mxu0 %v2556_v43 }
 0x373   :  { %1116 = vmatpush.msra.mxu2 %v2580_v9 }
 0x374   :  { %1163 = vmatpush.msra.mxu3 %v2580_v9  ;;  %1210 = vmatpush.msra.mxu0 %v2580_v9 }
 0x375   :  { %1117 = vmatpush.msra.mxu2 %v2585_v51 }
 0x376   :  { %1164 = vmatpush.msra.mxu3 %v2585_v51  ;;  %1211 = vmatpush.msra.mxu0 %v2585_v51 }
 0x377   :  { %1118 = vmatpush.msra.mxu2 %v2592_v54 }
 0x378   :  { %1165 = vmatpush.msra.mxu3 %v2592_v54  ;;  %1212 = vmatpush.msra.mxu0 %v2592_v54 }
 0x379   :  { %1119 = vmatpush.msra.mxu2 %v2605_v55 }
 0x37a   :  { %1166 = vmatpush.msra.mxu3 %v2605_v55  ;;  %1213 = vmatpush.msra.mxu0 %v2605_v55 }
 0x37b   :  { %1120 = vmatpush.msra.mxu2 %v2614_v56 }
 0x37c   :  { %1167 = vmatpush.msra.mxu3 %v2614_v56  ;;  %1214 = vmatpush.msra.mxu0 %v2614_v56 }
 0x37d   :  { %1121 = vmatpush.msra.mxu2 %v2623_v57 }
 0x37e   :  { %1168 = vmatpush.msra.mxu3 %v2623_v57  ;;  %1215 = vmatpush.msra.mxu0 %v2623_v57 }
 0x3dc   :  { %v881_v45 = vpop.f32.mrf.mxu0 }
 0x3dd   :  { %v884_v48 = vadd.f32 %v881_v45, %v105_v44  ;;  %v1226_v44 = vld [vmem:[%s2820_s10 + $0x28] sm:$0xff] }
 0x3df   :  { %1492 = vtanh.f32 %v884_v48 }
 0x3e1   :  { %v2653_v61 = vpop.f32.mrf.mxu3  ;;  %v802_v11 = vpop.f32.mrf.mxu2 }
 0x3e2   :  { %v844_v2 = vadd.f32 %v2653_v61, %v448_v47 }
 0x3e5   :  { %v1493_v49 = vpop.eup %1492 }
 0x3e6   :  { %920 = vmatmul.f32.vlgmr.msrb.gmra.mxu1 %v1493_v49  ;;  %959 = vmatmul.f32.vlgmr.msrb.gmra.mxu2 %v1493_v49 }
 0x3e7   :  { %999 = vmatmul.f32.vlgmr.msrb.gmra.mxu3 %v1493_v49  ;;  %1247 = vmatpush.msrb.mxu1 %v2484_v24 }
 0x3e8   :  { %1294 = vmatpush.msrb.mxu2 %v2484_v24  ;;  %1341 = vmatpush.msrb.mxu3 %v2484_v24 }
 0x3e9   :  { %1248 = vmatpush.msrb.mxu1 %v2489_v25 }
 0x3ea   :  { %1295 = vmatpush.msrb.mxu2 %v2489_v25  ;;  %1342 = vmatpush.msrb.mxu3 %v2489_v25 }
 0x3eb   :  { %1249 = vmatpush.msrb.mxu1 %v2496_v27 }
 0x3ec   :  { %1296 = vmatpush.msrb.mxu2 %v2496_v27  ;;  %1343 = vmatpush.msrb.mxu3 %v2496_v27 }
 0x3ed   :  { %1250 = vmatpush.msrb.mxu1 %v2504_v28 }
 0x3ee   :  { %1122 = vmatmul.f32.vlgmr.msra.gmra.mxu2 %v1086_v58  ;;  %1344 = vmatpush.msrb.mxu3 %v2504_v28  ;;  %v1179_v58 = vld [vmem:[%s2820_s10 + $0x30] sm:$0xff] }
 0x3ef   :  { %1251 = vmatpush.msrb.mxu1 %v2514_v35  ;;  %1297 = vmatpush.msrb.mxu2 %v2504_v28 }
 0x3f0   :  { %1345 = vmatpush.msrb.mxu3 %v2514_v35 }
 0x3f1   :  { %1252 = vmatpush.msrb.mxu1 %v2522_v36  ;;  %1298 = vmatpush.msrb.mxu2 %v2514_v35 }
 0x3f2   :  { %1346 = vmatpush.msrb.mxu3 %v2522_v36 }
 0x3f3   :  { %1253 = vmatpush.msrb.mxu1 %v2530_v37  ;;  %1299 = vmatpush.msrb.mxu2 %v2522_v36 }
 0x3f4   :  { %1347 = vmatpush.msrb.mxu3 %v2530_v37 }
 0x3f5   :  { %1254 = vmatpush.msrb.mxu1 %v2538_v39  ;;  %1300 = vmatpush.msrb.mxu2 %v2530_v37 }
 0x3f6   :  { %1348 = vmatpush.msrb.mxu3 %v2538_v39 }
 0x3f7   :  { %1255 = vmatpush.msrb.mxu1 %v2548_v41  ;;  %1301 = vmatpush.msrb.mxu2 %v2538_v39 }
 0x3f8   :  { %1349 = vmatpush.msrb.mxu3 %v2548_v41 }
 0x3f9   :  { %1256 = vmatpush.msrb.mxu1 %v2556_v43  ;;  %1302 = vmatpush.msrb.mxu2 %v2548_v41 }
 0x3fa   :  { %1350 = vmatpush.msrb.mxu3 %v2556_v43 }
 0x3fb   :  { %1257 = vmatpush.msrb.mxu1 %v2580_v9  ;;  %1303 = vmatpush.msrb.mxu2 %v2556_v43 }
 0x3fc   :  { %1351 = vmatpush.msrb.mxu3 %v2580_v9 }
 0x3fd   :  { %1258 = vmatpush.msrb.mxu1 %v2585_v51  ;;  %1304 = vmatpush.msrb.mxu2 %v2580_v9 }
 0x3fe   :  { %1352 = vmatpush.msrb.mxu3 %v2585_v51 }
 0x3ff   :  { %1259 = vmatpush.msrb.mxu1 %v2592_v54  ;;  %1305 = vmatpush.msrb.mxu2 %v2585_v51 }
 0x400   :  { %1353 = vmatpush.msrb.mxu3 %v2592_v54 }
 0x401   :  { %1260 = vmatpush.msrb.mxu1 %v2605_v55  ;;  %1306 = vmatpush.msrb.mxu2 %v2592_v54 }
 0x402   :  { %1354 = vmatpush.msrb.mxu3 %v2605_v55 }
 0x403   :  { %1261 = vmatpush.msrb.mxu1 %v2614_v56  ;;  %1307 = vmatpush.msrb.mxu2 %v2605_v55 }
 0x404   :  { %1355 = vmatpush.msrb.mxu3 %v2614_v56 }
 0x405   :  { %1262 = vmatpush.msrb.mxu1 %v2623_v57  ;;  %1308 = vmatpush.msrb.mxu2 %v2614_v56 }
 0x406   :  { %1356 = vmatpush.msrb.mxu3 %v2623_v57 }
 0x407   :  { %1309 = vmatpush.msrb.mxu2 %v2623_v57 }
 0x463   :  { %v2707_v4 = vpop.f32.mrf.mxu1 }
 0x469   :  { %v960_v8 = vpop.f32.mrf.mxu2 }
 0x46a   :  { %v1000_v63 = vpop.f32.mrf.mxu3  ;;  %v963_v50 = vadd.f32 %v960_v8, %v329_v46  ;;  %v1129_v8 = vld [vmem:[%s2820_s10] sm:$0xff] }
 0x46b   :  { %v1003_v1 = vadd.f32 %v1000_v63, %v108_v62 }
 0x46d   :  { %1494 = vtanh.f32 %v1003_v1  ;;  %v249_v1 = vadd.f32 %v2712_v12, %v2170_v23 }
 0x471   :  { %v1123_v30 = vpop.f32.mrf.mxu2 }
 0x473   :  { %v1495_v10 = vpop.eup %1494 }
 0x474   :  { %1085 = vst [vmem:[%s2819_s11] sm:$0xff] %v1495_v10  ;;  %1039 = vmatmul.f32.vlgmr.msrb.gmra.mxu0 %v1495_v10  ;;  %1078 = vmatmul.f32.vlgmr.msra.gmra.mxu1 %v1495_v10 }
 0x475   :  { %1388 = vmatpush.msrb.mxu0 %v2484_v24  ;;  %1435 = vmatpush.msra.mxu1 %v2484_v24  ;;  %v39_v24 = vand.u32 127, %v38_v20 }
 0x477   :  { %1389 = vmatpush.msrb.mxu0 %v2489_v25  ;;  %1436 = vmatpush.msra.mxu1 %v2489_v25  ;;  %v1270_v25 = vld [vmem:[%s2820_s10 + $0x18] sm:$0xff]  ;;  %vm40_vm0 = vcmp.lt.s32.totalorder %v39_v24, 5 }
 0x479   :  { %1390 = vmatpush.msrb.mxu0 %v2496_v27  ;;  %1437 = vmatpush.msra.mxu1 %v2496_v27  ;;  %v1273_v27 = vld [vmem:[%s2820_s10 + $0x20] sm:$0xff] }
 0x47b   :  { %1391 = vmatpush.msrb.mxu0 %v2504_v28  ;;  %1438 = vmatpush.msra.mxu1 %v2504_v28 }
 0x47d   :  { %1392 = vmatpush.msrb.mxu0 %v2514_v35  ;;  %1439 = vmatpush.msra.mxu1 %v2514_v35 }
 0x47f   :  { %1393 = vmatpush.msrb.mxu0 %v2522_v36  ;;  %1440 = vmatpush.msra.mxu1 %v2522_v36 }
 0x481   :  { %1394 = vmatpush.msrb.mxu0 %v2530_v37  ;;  %1441 = vmatpush.msra.mxu1 %v2530_v37  ;;  %v487_v37 = vadd.f32 %v2712_v12, %v2347_v14 }
 0x483   :  { %1395 = vmatpush.msrb.mxu0 %v2538_v39  ;;  %1442 = vmatpush.msra.mxu1 %v2538_v39  ;;  %v805_v39 = vadd.f32 %v802_v11, %v487_v37 }
 0x485   :  { %1396 = vmatpush.msrb.mxu0 %v2548_v41  ;;  %1443 = vmatpush.msra.mxu1 %v2548_v41 }
 0x487   :  { %1397 = vmatpush.msrb.mxu0 %v2556_v43  ;;  %1444 = vmatpush.msra.mxu1 %v2556_v43  ;;  %v1223_v43 = vld [vmem:[%s2820_s10 + $0x10] sm:$0xff] }
 0x489   :  { %1398 = vmatpush.msrb.mxu0 %v2580_v9  ;;  %1445 = vmatpush.msra.mxu1 %v2580_v9 }
 0x48b   :  { %1399 = vmatpush.msrb.mxu0 %v2585_v51  ;;  %1446 = vmatpush.msra.mxu1 %v2585_v51  ;;  %v368_v51 = vadd.f32 %v2712_v12, %v2196_v29 }
 0x48d   :  { %1400 = vmatpush.msrb.mxu0 %v2592_v54  ;;  %1447 = vmatpush.msra.mxu1 %v2592_v54  ;;  %v924_v54 = vadd.f32 %v2707_v4, %v368_v51 }
 0x48f   :  { %1401 = vmatpush.msrb.mxu0 %v2605_v55  ;;  %1448 = vmatpush.msra.mxu1 %v2605_v55 }
 0x491   :  { %1402 = vmatpush.msrb.mxu0 %v2614_v56  ;;  %1449 = vmatpush.msra.mxu1 %v2614_v56 }
 0x493   :  { %1403 = vmatpush.msrb.mxu0 %v2623_v57  ;;  %1450 = vmatpush.msra.mxu1 %v2623_v57  ;;  %v1176_v57 = vld [vmem:[%s2820_s10 + $0x8] sm:$0xff] }
 0x4f1   :  { %v1079_v26 = vpop.f32.mrf.mxu1  ;;  %v2721_v6 = vpop.f32.mrf.mxu0 }
 0x4f2   :  { %v1082_v34 = vadd.f32 %v1079_v26, %v210_v22  ;;  %v1043_v10 = vadd.f32 %v2721_v6, %v249_v1  ;;  %v1132_v22 = vld [vmem:[%s2820_s10 + $0x38] sm:$0xff] }
 0x4f4   :  { %v1126_v38 = vadd.f32 %v1123_v30, %v1082_v34 }
 0x4f6   :  { %1496 = vtanh.f32 %v1126_v38 }
 0x4fc   :  { %v2716_v42 = vpop.eup %1496 }
 0x4fd   :  { %1169 = vmatmul.f32.vlgmr.msra.gmra.mxu3 %v2716_v42  ;;  %v1130_v30 = vsel %vm40_vm0, %v2716_v42, %v1129_v8  ;;  %v1133_v23 = vsel %vm40_vm0, %v1132_v22, %v2716_v42 }
 0x580   :  { %v1170_v52 = vpop.f32.mrf.mxu3 }
 0x581   :  { %v1173_v53 = vadd.f32 %v1170_v52, %v963_v50 }
 0x583   :  { %1498 = vtanh.f32 %v1173_v53 }
 0x589   :  { %v1499_v0 = vpop.eup %1498 }
 0x58a   :  { %1216 = vmatmul.f32.vlgmr.msra.gmra.mxu0 %v1499_v0  ;;  %v1177_v61 = vsel %vm40_vm0, %v1499_v0, %v1176_v57  ;;  %v1180_v62 = vsel %vm40_vm0, %v1179_v58, %v1499_v0 }
 0x607   :  { %v1217_v3 = vpop.f32.mrf.mxu0 }
 0x608   :  { %v1220_v5 = vadd.f32 %v1217_v3, %v844_v2 }
 0x60a   :  { %1500 = vtanh.f32 %v1220_v5 }
 0x610   :  { %v1501_v13 = vpop.eup %1500 }
 0x611   :  { %1263 = vmatmul.f32.vlgmr.msrb.gmra.mxu1 %v1501_v13  ;;  %v1224_v48 = vsel %vm40_vm0, %v1501_v13, %v1223_v43  ;;  %v1227_v49 = vsel %vm40_vm0, %v1226_v44, %v1501_v13 }
 0x68e   :  { %v1264_v16 = vpop.f32.mrf.mxu1 }
 0x68f   :  { %v1267_v17 = vadd.f32 %v1264_v16, %v725_v15 }
 0x691   :  { %1502 = vtanh.f32 %v1267_v17 }
 0x697   :  { %v1503_v31 = vpop.eup %1502 }
 0x698   :  { %1310 = vmatmul.f32.vlgmr.msrb.gmra.mxu2 %v1503_v31  ;;  %v1271_v33 = vsel %vm40_vm0, %v1503_v31, %v1270_v25  ;;  %v1274_v18 = vsel %vm40_vm0, %v1273_v27, %v1503_v31 }
 0x71b   :  { %v1311_v21 = vpop.f32.mrf.mxu2 }
 0x71c   :  { %v1314_v7 = vadd.f32 %v1311_v21, %v686_v19 }
 0x71e   :  { %1504 = vtanh.f32 %v1314_v7 }
 0x724   :  { %v1505_v28 = vpop.eup %1504 }
 0x725   :  { %v1318_v35 = vsel %vm40_vm0, %v1505_v28, %v1274_v18  ;;  %v1321_v36 = vsel %vm40_vm0, %v1271_v33, %v1505_v28  ;;  %1357 = vmatmul.f32.vlgmr.msrb.gmra.mxu3 %v1505_v28 }
 0x726   :  { %1319 = vst [vmem:[%s2820_s10 + $0x20] sm:$0xff] %v1318_v35 }
 0x727   :  { %1322 = vst [vmem:[%s2820_s10 + $0x18] sm:$0xff] %v1321_v36 }
 0x7a8   :  { %v1358_v40 = vpop.f32.mrf.mxu3 }
 0x7a9   :  { %v1361_v41 = vadd.f32 %v1358_v40, %v805_v39 }
 0x7ab   :  { %1506 = vtanh.f32 %v1361_v41 }
 0x7b1   :  { %v1507_v45 = vpop.eup %1506 }
 0x7b2   :  { %v1365_v9 = vsel %vm40_vm0, %v1507_v45, %v1227_v49  ;;  %v1368_v14 = vsel %vm40_vm0, %v1224_v48, %v1507_v45  ;;  %1404 = vmatmul.f32.vlgmr.msrb.gmra.mxu0 %v1507_v45 }
 0x7b3   :  { %1366 = vst [vmem:[%s2820_s10 + $0x28] sm:$0xff] %v1365_v9 }
 0x7b4   :  { %1369 = vst [vmem:[%s2820_s10 + $0x10] sm:$0xff] %v1368_v14 }
 0x82f   :  { %v1405_v55 = vpop.f32.mrf.mxu0 }
 0x830   :  { %v1408_v56 = vadd.f32 %v1405_v55, %v924_v54 }
 0x832   :  { %1508 = vtanh.f32 %v1408_v56 }
 0x838   :  { %v1509_v60 = vpop.eup %1508 }
 0x839   :  { %v1412_v29 = vsel %vm40_vm0, %v1509_v60, %v1180_v62  ;;  %v1415_v63 = vsel %vm40_vm0, %v1177_v61, %v1509_v60  ;;  %1451 = vmatmul.f32.vlgmr.msra.gmra.mxu1 %v1509_v60 }
 0x83a   :  { %1413 = vst [vmem:[%s2820_s10 + $0x30] sm:$0xff] %v1412_v29 }
 0x83b   :  { %1416 = vst [vmem:[%s2820_s10 + $0x8] sm:$0xff] %v1415_v63 }
 0x8b6   :  { %v1452_v11 = vpop.f32.mrf.mxu1 }
 0x8b7   :  { %v1455_v4 = vadd.f32 %v1452_v11, %v1043_v10 }
 0x8b9   :  { %1510 = vtanh.f32 %v1455_v4 }
 0x8bf   :  { %v1511_v26 = vpop.eup %1510 }
 0x8c0   :  { %v1459_v12 = vsel %vm40_vm0, %v1511_v26, %v1133_v23  ;;  %v1462_v34 = vsel %vm40_vm0, %v1130_v30, %v1511_v26  ;;  %1465 = vst [vmem:[%s2821_s12] sm:$0xff] %v1511_v26 }
 0x8c1   :  { %1460 = vst [vmem:[%s2820_s10 + $0x38] sm:$0xff] %v1459_v12 }
 0x8c2   :  { %1463 = vst [vmem:[%s2820_s10] sm:$0xff] %v1462_v34 }

</bundles_post_ra>
